<compile_context>
chip_gen: v7x
topology: tpu7x:2x2x1
jax: 0.10.0
libtpu: 0.0.40
codegen_flags: <defaults>
</compile_context>

<pallas_src>
import functools

import numpy as np
import jax
import jax.numpy as jnp
from jax import lax
from jax.experimental import pallas as pl
from jax.experimental.pallas import tpu as pltpu


# ----------------------------- hyperparameters -------------------------------
class HP:
    Nz_dec = 16
    input_dim = 5
    dec_hidden_size = 32      # H
    dec_layers = 2            # L
    M = 8                     # mixture components
    dropout = 0.1             # eval mode -> unused
    Nmax = 7


hp = HP()
H = hp.dec_hidden_size
L = hp.dec_layers
M = hp.M
IN0 = hp.Nz_dec + hp.input_dim      # LSTM layer-0 input width (style_label=False)

_VMEM = functools.partial(pl.BlockSpec, memory_space=pltpu.MemorySpace.VMEM)


# -------------------------------- kernel --------------------------------------
def _decoder_kernel(x_ref, z_ref,
                    whc_ref, bhc_ref,
                    wih0_ref, whh0_ref, b0_ref,
                    wih1_ref, whh1_ref, b1_ref,
                    wp_ref, bp_ref,
                    y_ref, hN_ref, cN_ref):
    """Fused fc_hc -> 2-layer LSTM (time unrolled) -> fc_params.

    x_ref   : (T*B, IN0)  f32, time-major flattened inputs
    z_ref   : (B, Nz)     f32
    whc_ref : (Nz, 2*H*L) f32   (pre-transposed fc_hc weight)
    wih0/whh0/wih1/whh1 : (*, 4H) bf16 (pre-transposed), biases pre-summed (1,4H) f32
    wp_ref  : (H, 6M)     f32   columns pre-grouped [pi | mu_x | mu_y | sx | sy | rho]
    y_ref   : (T*B, 6M)   f32   packed transformed mixture parameters
    hN_ref / cN_ref : (L, B, H) final LSTM states
    """
    B = z_ref.shape[0]
    T = x_ref.shape[0] // B

    # ---- fc_hc: tanh(z @ W^T + b); columns are [h_l0 | h_l1 | c_l0 | c_l1] ----
    hc = jnp.tanh(jnp.dot(z_ref[...], whc_ref[...],
                          preferred_element_type=jnp.float32) + bhc_ref[...])
    h0 = hc[:, 0 * H:1 * H]          # layer-0 hidden  (B, H)
    h1 = hc[:, 1 * H:2 * H]          # layer-1 hidden
    c0 = hc[:, 2 * H:3 * H]          # layer-0 cell
    c1 = hc[:, 3 * H:4 * H]          # layer-1 cell

    # ---- hoist recurrent weights (loaded once, stay in vregs) ----
    whh0 = whh0_ref[...]
    wih1 = wih1_ref[...]
    whh1 = whh1_ref[...]
    b1 = b1_ref[...]

    # ---- layer-0 input projection for ALL timesteps (off the serial chain) ----
    xg_all = (jnp.dot(x_ref[...].astype(jnp.bfloat16), wih0_ref[...],
                      preferred_element_type=jnp.float32)
              + b0_ref[...])                                   # (T*B, 4H) f32

    def gates_to_hc(g, c_prev):
        i = jax.nn.sigmoid(g[:, 0 * H:1 * H])
        f = jax.nn.sigmoid(g[:, 1 * H:2 * H])
        gg = jnp.tanh(g[:, 2 * H:3 * H])
        o = jax.nn.sigmoid(g[:, 3 * H:4 * H])
        c_new = f * c_prev + i * gg
        h_new = o * jnp.tanh(c_new)
        return h_new, c_new

    # ---- time loop: fully unrolled (T static), state carried in vregs ----
    outs = []
    for t in range(T):
        g0 = (xg_all[t * B:(t + 1) * B, :]
              + jnp.dot(h0.astype(jnp.bfloat16), whh0,
                        preferred_element_type=jnp.float32))
        h0, c0 = gates_to_hc(g0, c0)
        # keep the two layer-1 matmuls separate: dot(h1_prev, whh1) is off the
        # current-step critical path and can be overlapped by the scheduler.
        g1 = (jnp.dot(h0.astype(jnp.bfloat16), wih1,
                      preferred_element_type=jnp.float32)
              + jnp.dot(h1.astype(jnp.bfloat16), whh1,
                        preferred_element_type=jnp.float32)
              + b1)
        h1, c1 = gates_to_hc(g1, c1)
        outs.append(h1)

    # ---- final LSTM states (written once) ----
    hN_ref[0] = h0
    hN_ref[1] = h1
    cN_ref[0] = c0
    cN_ref[1] = c1

    # ---- fc_params + mixture transforms, straight from vregs ----
    out_all = jnp.concatenate(outs, axis=0)                    # (T*B, H)
    y = (jnp.dot(out_all, wp_ref[...], preferred_element_type=jnp.float32)
         + bp_ref[...])                                        # (T*B, 6M)

    logits = y[:, 0:M]
    mx = jnp.max(logits, axis=-1, keepdims=True)
    e = jnp.exp(logits - mx)
    pi = e * pl.reciprocal(jnp.sum(e, axis=-1, keepdims=True), approx=True)

    y_ref[...] = jnp.concatenate(
        [pi,                               # pi (softmax)
         y[:, 1 * M:3 * M],                # mu_x, mu_y
         jnp.exp(y[:, 3 * M:5 * M]),       # sigma_x, sigma_y
         jnp.tanh(y[:, 5 * M:6 * M])],     # rho_xy
        axis=-1)


# --------------------------- parameter preparation -----------------------------
def prepare_params(params):
    """One-time, host-side weight prep (transposes, bias sums, column grouping,
    bf16 cast of LSTM weights).  Keep outside the per-call forward path."""
    (w_hc, b_hc,
     wih0, whh0, bih0, bhh0,
     wih1, whh1, bih1, bhh1,
     w_p, b_p) = params

    # regroup fc_params rows so contiguous column blocks are
    # [pi | mu_x | mu_y | sigma_x | sigma_y | rho]  (PyTorch uses y[:, k::6])
    idx = np.concatenate([np.arange(k, 6 * M, 6) for k in range(6)])

    return (
        jnp.asarray(w_hc).T,                              # (Nz, 2*H*L) f32
        jnp.asarray(b_hc).reshape(1, -1),
        jnp.asarray(wih0).T.astype(jnp.bfloat16),         # (IN0, 4H)
        jnp.asarray(whh0).T.astype(jnp.bfloat16),         # (H, 4H)
        (jnp.asarray(bih0) + jnp.asarray(bhh0)).reshape(1, -1),
        jnp.asarray(wih1).T.astype(jnp.bfloat16),         # (H, 4H)
        jnp.asarray(whh1).T.astype(jnp.bfloat16),         # (H, 4H)
        (jnp.asarray(bih1) + jnp.asarray(bhh1)).reshape(1, -1),
        jnp.asarray(w_p)[idx].T,                          # (H, 6M) f32
        jnp.asarray(b_p)[idx].reshape(1, -1),
    )


# --------------------------- full forward pass --------------------------------
def lstm_decoder_forward(inputs, z, prepped):
    """Pallas implementation of LSTMDecoder.forward (eval mode, labels=None,
    hidden_cell=None).  `prepped` comes from prepare_params()."""
    T, B, F = inputs.shape
    x2d = inputs.reshape(T * B, F)                        # time-major flatten

    y, hN, cN = pl.pallas_call(
        _decoder_kernel,
        out_shape=(jax.ShapeDtypeStruct((T * B, 6 * M), jnp.float32),
                   jax.ShapeDtypeStruct((L, B, H), jnp.float32),
                   jax.ShapeDtypeStruct((L, B, H), jnp.float32)),
        in_specs=[_VMEM()] * 12,
        out_specs=(_VMEM(), _VMEM(), _VMEM()),
    )(x2d, z, *prepped)

    # TODO(synk): inter-layer dropout / len_out = Nmax+1 (training mode) not
    # implemented; eval path only.
    len_out = 1
    shp = (len_out, -1, M)
    return (y[:, 0 * M:1 * M].reshape(shp),   # pi
            y[:, 1 * M:2 * M].reshape(shp),   # mu_x
            y[:, 2 * M:3 * M].reshape(shp),   # mu_y
            y[:, 3 * M:4 * M].reshape(shp),   # sigma_x
            y[:, 4 * M:5 * M].reshape(shp),   # sigma_y
            y[:, 5 * M:6 * M].reshape(shp),   # rho_xy
            hN, cN)


# --------------------------- pure-JAX reference --------------------------------
def lstm_decoder_reference(inputs, z, params):
    (w_hc, b_hc,
     wih0, whh0, bih0, bhh0,
     wih1, whh1, bih1, bhh1,
     w_p, b_p) = params
    T, B, _ = inputs.shape

    hc = jnp.tanh(z @ w_hc.T + b_hc)
    h = jnp.transpose(hc[:, :H * L].reshape(B, L, H), (1, 0, 2))
    c = jnp.transpose(hc[:, H * L:].reshape(B, L, H), (1, 0, 2))

    def cell(x, h_, c_, wih, whh, bih, bhh):
        g = x @ wih.T + bih + h_ @ whh.T + bhh
        i = jax.nn.sigmoid(g[:, :H])
        f = jax.nn.sigmoid(g[:, H:2 * H])
        gg = jnp.tanh(g[:, 2 * H:3 * H])
        o = jax.nn.sigmoid(g[:, 3 * H:])
        c_new = f * c_ + i * gg
        return o * jnp.tanh(c_new), c_new

    def step(carry, x):
        h_, c_ = carry
        h0n, c0n = cell(x, h_[0], c_[0], wih0, whh0, bih0, bhh0)
        h1n, c1n = cell(h0n, h_[1], c_[1], wih1, whh1, bih1, bhh1)
        return (jnp.stack([h0n, h1n]), jnp.stack([c0n, c1n])), h1n

    (hN, cN), outs = lax.scan(step, (h, c), inputs)
    y = outs.reshape(-1, H) @ w_p.T + b_p                         # (T*B, 6M)
    pi = jax.nn.softmax(y[:, 0::6], axis=-1)
    mu_x, mu_y = y[:, 1::6], y[:, 2::6]
    sx, sy = jnp.exp(y[:, 3::6]), jnp.exp(y[:, 4::6])
    rho = jnp.tanh(y[:, 5::6])
    shp = (1, -1, M)
    return (pi.reshape(shp), mu_x.reshape(shp), mu_y.reshape(shp),
            sx.reshape(shp), sy.reshape(shp), rho.reshape(shp), hN, cN)


# ----------------------------------- main --------------------------------------
if __name__ == "__main__":
    T, B = 8, 2

    # deterministic inputs
    kin = jax.random.PRNGKey(0)
    k_inp, k_z = jax.random.split(kin)
    inputs = jax.random.normal(k_inp, (T, B, IN0), dtype=jnp.float32)
    z = jax.random.normal(k_z, (B, hp.Nz_dec), dtype=jnp.float32)

    # deterministic parameters (synthetic init; shapes match nn.Module.__init__)
    kp = jax.random.PRNGKey(42)
    ks = jax.random.split(kp, 12)
    s = 0.08
    w_hc = s * jax.random.normal(ks[0], (2 * H * L, hp.Nz_dec), jnp.float32)
    b_hc = s * jax.random.normal(ks[1], (2 * H * L,), jnp.float32)
    wih0 = s * jax.random.normal(ks[2], (4 * H, IN0), jnp.float32)
    whh0 = s * jax.random.normal(ks[3], (4 * H, H), jnp.float32)
    bih0 = s * jax.random.normal(ks[4], (4 * H,), jnp.float32)
    bhh0 = s * jax.random.normal(ks[5], (4 * H,), jnp.float32)
    wih1 = s * jax.random.normal(ks[6], (4 * H, H), jnp.float32)
    whh1 = s * jax.random.normal(ks[7], (4 * H, H), jnp.float32)
    bih1 = s * jax.random.normal(ks[8], (4 * H,), jnp.float32)
    bhh1 = s * jax.random.normal(ks[9], (4 * H,), jnp.float32)
    w_p = s * jax.random.normal(ks[10], (6 * M, H), jnp.float32)
    b_p = s * jax.random.normal(ks[11], (6 * M,), jnp.float32)

    params = (w_hc, b_hc, wih0, whh0, bih0, bhh0,
              wih1, whh1, bih1, bhh1, w_p, b_p)

    prepped = prepare_params(params)              # one-time weight prep

    out = jax.block_until_ready(lstm_decoder_forward(inputs, z, prepped))
    ref = jax.block_until_ready(lstm_decoder_reference(inputs, z, params))

    names = ["pi", "mu_x", "mu_y", "sigma_x", "sigma_y", "rho_xy", "hidden", "cell"]
    for n, a, b in zip(names, out, ref):
        assert a.shape == b.shape, (n, a.shape, b.shape)
        assert jnp.allclose(a, b, atol=5e-2, rtol=5e-2), n

    print("KERNEL_OK")
</pallas_src>

<mosaic_0001>
module attributes {stable_mosaic.version = 11 : i64} {
  func.func @_decoder_kernel(%arg0: memref<16x21xf32, #tpu.memory_space<vmem>>, %arg1: memref<2x16xf32, #tpu.memory_space<vmem>>, %arg2: memref<16x128xf32, #tpu.memory_space<vmem>>, %arg3: memref<1x128xf32, #tpu.memory_space<vmem>>, %arg4: memref<21x128xbf16, #tpu.memory_space<vmem>>, %arg5: memref<32x128xbf16, #tpu.memory_space<vmem>>, %arg6: memref<1x128xf32, #tpu.memory_space<vmem>>, %arg7: memref<32x128xbf16, #tpu.memory_space<vmem>>, %arg8: memref<32x128xbf16, #tpu.memory_space<vmem>>, %arg9: memref<1x128xf32, #tpu.memory_space<vmem>>, %arg10: memref<32x48xf32, #tpu.memory_space<vmem>>, %arg11: memref<1x48xf32, #tpu.memory_space<vmem>>, %arg12: memref<16x48xf32, #tpu.memory_space<vmem>>, %arg13: memref<2x2x32xf32, #tpu.memory_space<vmem>>, %arg14: memref<2x2x32xf32, #tpu.memory_space<vmem>>) attributes {dimension_semantics = [], scalar_prefetch = 0 : i64, scratch_operands = 0 : i64, tpu.core_type = #tpu.core_type<tc>} {
    %c0 = arith.constant 0 : index
    %c0_0 = arith.constant 0 : index
    %0 = vector.load %arg1[%c0, %c0_0] : memref<2x16xf32, #tpu.memory_space<vmem>>, vector<2x16xf32>
    %c0_1 = arith.constant 0 : index
    %c0_2 = arith.constant 0 : index
    %1 = vector.load %arg2[%c0_1, %c0_2] : memref<16x128xf32, #tpu.memory_space<vmem>>, vector<16x128xf32>
    %cst = arith.constant dense<0.000000e+00> : vector<2x128xf32>
    %2 = tpu.matmul %0, %1, %cst {dimension_numbers = #tpu.dot_dimension_numbers<[1], [0], [0], [1], [0, 0, 1, 1], [], []>} : vector<2x16xf32>, vector<16x128xf32>, vector<2x128xf32> -> vector<2x128xf32>
    %c0_3 = arith.constant 0 : index
    %c0_4 = arith.constant 0 : index
    %3 = vector.load %arg3[%c0_3, %c0_4] : memref<1x128xf32, #tpu.memory_space<vmem>>, vector<1x128xf32>
    %4 = vector.broadcast %3 : vector<1x128xf32> to vector<2x128xf32>
    %5 = arith.addf %2, %4 : vector<2x128xf32>
    %6 = math.tanh %5 : vector<2x128xf32>
    %7 = vector.extract_strided_slice %6 {offsets = [0, 0], sizes = [2, 32], strides = [1, 1]} : vector<2x128xf32> to vector<2x32xf32>
    %8 = vector.extract_strided_slice %6 {offsets = [0, 32], sizes = [2, 32], strides = [1, 1]} : vector<2x128xf32> to vector<2x32xf32>
    %9 = vector.extract_strided_slice %6 {offsets = [0, 64], sizes = [2, 32], strides = [1, 1]} : vector<2x128xf32> to vector<2x32xf32>
    %10 = vector.extract_strided_slice %6 {offsets = [0, 96], sizes = [2, 32], strides = [1, 1]} : vector<2x128xf32> to vector<2x32xf32>
    %c0_5 = arith.constant 0 : index
    %c0_6 = arith.constant 0 : index
    %11 = vector.load %arg5[%c0_5, %c0_6] : memref<32x128xbf16, #tpu.memory_space<vmem>>, vector<32x128xbf16>
    %c0_7 = arith.constant 0 : index
    %c0_8 = arith.constant 0 : index
    %12 = vector.load %arg7[%c0_7, %c0_8] : memref<32x128xbf16, #tpu.memory_space<vmem>>, vector<32x128xbf16>
    %c0_9 = arith.constant 0 : index
    %c0_10 = arith.constant 0 : index
    %13 = vector.load %arg8[%c0_9, %c0_10] : memref<32x128xbf16, #tpu.memory_space<vmem>>, vector<32x128xbf16>
    %c0_11 = arith.constant 0 : index
    %c0_12 = arith.constant 0 : index
    %14 = vector.load %arg9[%c0_11, %c0_12] : memref<1x128xf32, #tpu.memory_space<vmem>>, vector<1x128xf32>
    %c0_13 = arith.constant 0 : index
    %c0_14 = arith.constant 0 : index
    %15 = vector.load %arg0[%c0_13, %c0_14] : memref<16x21xf32, #tpu.memory_space<vmem>>, vector<16x21xf32>
    %16 = arith.truncf %15 : vector<16x21xf32> to vector<16x21xbf16>
    %c0_15 = arith.constant 0 : index
    %c0_16 = arith.constant 0 : index
    %17 = vector.load %arg4[%c0_15, %c0_16] : memref<21x128xbf16, #tpu.memory_space<vmem>>, vector<21x128xbf16>
    %cst_17 = arith.constant dense<0.000000e+00> : vector<16x128xf32>
    %18 = tpu.matmul %16, %17, %cst_17 {dimension_numbers = #tpu.dot_dimension_numbers<[1], [0], [0], [1], [0, 0, 1, 1], [], []>} : vector<16x21xbf16>, vector<21x128xbf16>, vector<16x128xf32> -> vector<16x128xf32>
    %c0_18 = arith.constant 0 : index
    %c0_19 = arith.constant 0 : index
    %19 = vector.load %arg6[%c0_18, %c0_19] : memref<1x128xf32, #tpu.memory_space<vmem>>, vector<1x128xf32>
    %20 = vector.broadcast %19 : vector<1x128xf32> to vector<16x128xf32>
    %21 = arith.addf %18, %20 : vector<16x128xf32>
    %22 = vector.extract_strided_slice %21 {offsets = [0, 0], sizes = [2, 128], strides = [1, 1]} : vector<16x128xf32> to vector<2x128xf32>
    %23 = arith.truncf %7 : vector<2x32xf32> to vector<2x32xbf16>
    %cst_20 = arith.constant dense<0.000000e+00> : vector<2x128xf32>
    %24 = tpu.matmul %23, %11, %cst_20 {dimension_numbers = #tpu.dot_dimension_numbers<[1], [0], [0], [1], [0, 0, 1, 1], [], []>} : vector<2x32xbf16>, vector<32x128xbf16>, vector<2x128xf32> -> vector<2x128xf32>
    %25 = arith.addf %22, %24 : vector<2x128xf32>
    %26 = vector.extract_strided_slice %25 {offsets = [0, 0], sizes = [2, 32], strides = [1, 1]} : vector<2x128xf32> to vector<2x32xf32>
    %27 = arith.negf %26 : vector<2x32xf32>
    %28 = math.exp %27 : vector<2x32xf32>
    %cst_21 = arith.constant 1.000000e+00 : f32
    %29 = vector.broadcast %cst_21 : f32 to vector<2x32xf32>
    %30 = arith.addf %29, %28 : vector<2x32xf32>
    %31 = arith.divf %29, %30 : vector<2x32xf32>
    %32 = vector.extract_strided_slice %25 {offsets = [0, 32], sizes = [2, 32], strides = [1, 1]} : vector<2x128xf32> to vector<2x32xf32>
    %33 = arith.negf %32 : vector<2x32xf32>
    %34 = math.exp %33 : vector<2x32xf32>
    %cst_22 = arith.constant 1.000000e+00 : f32
    %35 = vector.broadcast %cst_22 : f32 to vector<2x32xf32>
    %36 = arith.addf %35, %34 : vector<2x32xf32>
    %37 = arith.divf %35, %36 : vector<2x32xf32>
    %38 = vector.extract_strided_slice %25 {offsets = [0, 64], sizes = [2, 32], strides = [1, 1]} : vector<2x128xf32> to vector<2x32xf32>
    %39 = math.tanh %38 : vector<2x32xf32>
    %40 = vector.extract_strided_slice %25 {offsets = [0, 96], sizes = [2, 32], strides = [1, 1]} : vector<2x128xf32> to vector<2x32xf32>
    %41 = arith.negf %40 : vector<2x32xf32>
    %42 = math.exp %41 : vector<2x32xf32>
    %cst_23 = arith.constant 1.000000e+00 : f32
    %43 = vector.broadcast %cst_23 : f32 to vector<2x32xf32>
    %44 = arith.addf %43, %42 : vector<2x32xf32>
    %45 = arith.divf %43, %44 : vector<2x32xf32>
    %46 = arith.mulf %37, %9 : vector<2x32xf32>
    %47 = arith.mulf %31, %39 : vector<2x32xf32>
    %48 = arith.addf %46, %47 : vector<2x32xf32>
    %49 = math.tanh %48 : vector<2x32xf32>
    %50 = arith.mulf %45, %49 : vector<2x32xf32>
    %51 = arith.truncf %50 : vector<2x32xf32> to vector<2x32xbf16>
    %cst_24 = arith.constant dense<0.000000e+00> : vector<2x128xf32>
    %52 = tpu.matmul %51, %12, %cst_24 {dimension_numbers = #tpu.dot_dimension_numbers<[1], [0], [0], [1], [0, 0, 1, 1], [], []>} : vector<2x32xbf16>, vector<32x128xbf16>, vector<2x128xf32> -> vector<2x128xf32>
    %53 = arith.truncf %8 : vector<2x32xf32> to vector<2x32xbf16>
    %cst_25 = arith.constant dense<0.000000e+00> : vector<2x128xf32>
    %54 = tpu.matmul %53, %13, %cst_25 {dimension_numbers = #tpu.dot_dimension_numbers<[1], [0], [0], [1], [0, 0, 1, 1], [], []>} : vector<2x32xbf16>, vector<32x128xbf16>, vector<2x128xf32> -> vector<2x128xf32>
    %55 = arith.addf %52, %54 : vector<2x128xf32>
    %56 = vector.broadcast %14 : vector<1x128xf32> to vector<2x128xf32>
    %57 = arith.addf %55, %56 : vector<2x128xf32>
    %58 = vector.extract_strided_slice %57 {offsets = [0, 0], sizes = [2, 32], strides = [1, 1]} : vector<2x128xf32> to vector<2x32xf32>
    %59 = arith.negf %58 : vector<2x32xf32>
    %60 = math.exp %59 : vector<2x32xf32>
    %cst_26 = arith.constant 1.000000e+00 : f32
    %61 = vector.broadcast %cst_26 : f32 to vector<2x32xf32>
    %62 = arith.addf %61, %60 : vector<2x32xf32>
    %63 = arith.divf %61, %62 : vector<2x32xf32>
    %64 = vector.extract_strided_slice %57 {offsets = [0, 32], sizes = [2, 32], strides = [1, 1]} : vector<2x128xf32> to vector<2x32xf32>
    %65 = arith.negf %64 : vector<2x32xf32>
    %66 = math.exp %65 : vector<2x32xf32>
    %cst_27 = arith.constant 1.000000e+00 : f32
    %67 = vector.broadcast %cst_27 : f32 to vector<2x32xf32>
    %68 = arith.addf %67, %66 : vector<2x32xf32>
    %69 = arith.divf %67, %68 : vector<2x32xf32>
    %70 = vector.extract_strided_slice %57 {offsets = [0, 64], sizes = [2, 32], strides = [1, 1]} : vector<2x128xf32> to vector<2x32xf32>
    %71 = math.tanh %70 : vector<2x32xf32>
    %72 = vector.extract_strided_slice %57 {offsets = [0, 96], sizes = [2, 32], strides = [1, 1]} : vector<2x128xf32> to vector<2x32xf32>
    %73 = arith.negf %72 : vector<2x32xf32>
    %74 = math.exp %73 : vector<2x32xf32>
    %cst_28 = arith.constant 1.000000e+00 : f32
    %75 = vector.broadcast %cst_28 : f32 to vector<2x32xf32>
    %76 = arith.addf %75, %74 : vector<2x32xf32>
    %77 = arith.divf %75, %76 : vector<2x32xf32>
    %78 = arith.mulf %69, %10 : vector<2x32xf32>
    %79 = arith.mulf %63, %71 : vector<2x32xf32>
    %80 = arith.addf %78, %79 : vector<2x32xf32>
    %81 = math.tanh %80 : vector<2x32xf32>
    %82 = arith.mulf %77, %81 : vector<2x32xf32>
    %83 = vector.extract_strided_slice %21 {offsets = [2, 0], sizes = [2, 128], strides = [1, 1]} : vector<16x128xf32> to vector<2x128xf32>
    %84 = arith.truncf %50 : vector<2x32xf32> to vector<2x32xbf16>
    %cst_29 = arith.constant dense<0.000000e+00> : vector<2x128xf32>
    %85 = tpu.matmul %84, %11, %cst_29 {dimension_numbers = #tpu.dot_dimension_numbers<[1], [0], [0], [1], [0, 0, 1, 1], [], []>} : vector<2x32xbf16>, vector<32x128xbf16>, vector<2x128xf32> -> vector<2x128xf32>
    %86 = arith.addf %83, %85 : vector<2x128xf32>
    %87 = vector.extract_strided_slice %86 {offsets = [0, 0], sizes = [2, 32], strides = [1, 1]} : vector<2x128xf32> to vector<2x32xf32>
    %88 = arith.negf %87 : vector<2x32xf32>
    %89 = math.exp %88 : vector<2x32xf32>
    %cst_30 = arith.constant 1.000000e+00 : f32
    %90 = vector.broadcast %cst_30 : f32 to vector<2x32xf32>
    %91 = arith.addf %90, %89 : vector<2x32xf32>
    %92 = arith.divf %90, %91 : vector<2x32xf32>
    %93 = vector.extract_strided_slice %86 {offsets = [0, 32], sizes = [2, 32], strides = [1, 1]} : vector<2x128xf32> to vector<2x32xf32>
    %94 = arith.negf %93 : vector<2x32xf32>
    %95 = math.exp %94 : vector<2x32xf32>
    %cst_31 = arith.constant 1.000000e+00 : f32
    %96 = vector.broadcast %cst_31 : f32 to vector<2x32xf32>
    %97 = arith.addf %96, %95 : vector<2x32xf32>
    %98 = arith.divf %96, %97 : vector<2x32xf32>
    %99 = vector.extract_strided_slice %86 {offsets = [0, 64], sizes = [2, 32], strides = [1, 1]} : vector<2x128xf32> to vector<2x32xf32>
    %100 = math.tanh %99 : vector<2x32xf32>
    %101 = vector.extract_strided_slice %86 {offsets = [0, 96], sizes = [2, 32], strides = [1, 1]} : vector<2x128xf32> to vector<2x32xf32>
    %102 = arith.negf %101 : vector<2x32xf32>
    %103 = math.exp %102 : vector<2x32xf32>
    %cst_32 = arith.constant 1.000000e+00 : f32
    %104 = vector.broadcast %cst_32 : f32 to vector<2x32xf32>
    %105 = arith.addf %104, %103 : vector<2x32xf32>
    %106 = arith.divf %104, %105 : vector<2x32xf32>
    %107 = arith.mulf %98, %48 : vector<2x32xf32>
    %108 = arith.mulf %92, %100 : vector<2x32xf32>
    %109 = arith.addf %107, %108 : vector<2x32xf32>
    %110 = math.tanh %109 : vector<2x32xf32>
    %111 = arith.mulf %106, %110 : vector<2x32xf32>
    %112 = arith.truncf %111 : vector<2x32xf32> to vector<2x32xbf16>
    %cst_33 = arith.constant dense<0.000000e+00> : vector<2x128xf32>
    %113 = tpu.matmul %112, %12, %cst_33 {dimension_numbers = #tpu.dot_dimension_numbers<[1], [0], [0], [1], [0, 0, 1, 1], [], []>} : vector<2x32xbf16>, vector<32x128xbf16>, vector<2x128xf32> -> vector<2x128xf32>
    %114 = arith.truncf %82 : vector<2x32xf32> to vector<2x32xbf16>
    %cst_34 = arith.constant dense<0.000000e+00> : vector<2x128xf32>
    %115 = tpu.matmul %114, %13, %cst_34 {dimension_numbers = #tpu.dot_dimension_numbers<[1], [0], [0], [1], [0, 0, 1, 1], [], []>} : vector<2x32xbf16>, vector<32x128xbf16>, vector<2x128xf32> -> vector<2x128xf32>
    %116 = arith.addf %113, %115 : vector<2x128xf32>
    %117 = vector.broadcast %14 : vector<1x128xf32> to vector<2x128xf32>
    %118 = arith.addf %116, %117 : vector<2x128xf32>
    %119 = vector.extract_strided_slice %118 {offsets = [0, 0], sizes = [2, 32], strides = [1, 1]} : vector<2x128xf32> to vector<2x32xf32>
    %120 = arith.negf %119 : vector<2x32xf32>
    %121 = math.exp %120 : vector<2x32xf32>
    %cst_35 = arith.constant 1.000000e+00 : f32
    %122 = vector.broadcast %cst_35 : f32 to vector<2x32xf32>
    %123 = arith.addf %122, %121 : vector<2x32xf32>
    %124 = arith.divf %122, %123 : vector<2x32xf32>
    %125 = vector.extract_strided_slice %118 {offsets = [0, 32], sizes = [2, 32], strides = [1, 1]} : vector<2x128xf32> to vector<2x32xf32>
    %126 = arith.negf %125 : vector<2x32xf32>
    %127 = math.exp %126 : vector<2x32xf32>
    %cst_36 = arith.constant 1.000000e+00 : f32
    %128 = vector.broadcast %cst_36 : f32 to vector<2x32xf32>
    %129 = arith.addf %128, %127 : vector<2x32xf32>
    %130 = arith.divf %128, %129 : vector<2x32xf32>
    %131 = vector.extract_strided_slice %118 {offsets = [0, 64], sizes = [2, 32], strides = [1, 1]} : vector<2x128xf32> to vector<2x32xf32>
    %132 = math.tanh %131 : vector<2x32xf32>
    %133 = vector.extract_strided_slice %118 {offsets = [0, 96], sizes = [2, 32], strides = [1, 1]} : vector<2x128xf32> to vector<2x32xf32>
    %134 = arith.negf %133 : vector<2x32xf32>
    %135 = math.exp %134 : vector<2x32xf32>
    %cst_37 = arith.constant 1.000000e+00 : f32
    %136 = vector.broadcast %cst_37 : f32 to vector<2x32xf32>
    %137 = arith.addf %136, %135 : vector<2x32xf32>
    %138 = arith.divf %136, %137 : vector<2x32xf32>
    %139 = arith.mulf %130, %80 : vector<2x32xf32>
    %140 = arith.mulf %124, %132 : vector<2x32xf32>
    %141 = arith.addf %139, %140 : vector<2x32xf32>
    %142 = math.tanh %141 : vector<2x32xf32>
    %143 = arith.mulf %138, %142 : vector<2x32xf32>
    %144 = vector.extract_strided_slice %21 {offsets = [4, 0], sizes = [2, 128], strides = [1, 1]} : vector<16x128xf32> to vector<2x128xf32>
    %145 = arith.truncf %111 : vector<2x32xf32> to vector<2x32xbf16>
    %cst_38 = arith.constant dense<0.000000e+00> : vector<2x128xf32>
    %146 = tpu.matmul %145, %11, %cst_38 {dimension_numbers = #tpu.dot_dimension_numbers<[1], [0], [0], [1], [0, 0, 1, 1], [], []>} : vector<2x32xbf16>, vector<32x128xbf16>, vector<2x128xf32> -> vector<2x128xf32>
    %147 = arith.addf %144, %146 : vector<2x128xf32>
    %148 = vector.extract_strided_slice %147 {offsets = [0, 0], sizes = [2, 32], strides = [1, 1]} : vector<2x128xf32> to vector<2x32xf32>
    %149 = arith.negf %148 : vector<2x32xf32>
    %150 = math.exp %149 : vector<2x32xf32>
    %cst_39 = arith.constant 1.000000e+00 : f32
    %151 = vector.broadcast %cst_39 : f32 to vector<2x32xf32>
    %152 = arith.addf %151, %150 : vector<2x32xf32>
    %153 = arith.divf %151, %152 : vector<2x32xf32>
    %154 = vector.extract_strided_slice %147 {offsets = [0, 32], sizes = [2, 32], strides = [1, 1]} : vector<2x128xf32> to vector<2x32xf32>
    %155 = arith.negf %154 : vector<2x32xf32>
    %156 = math.exp %155 : vector<2x32xf32>
    %cst_40 = arith.constant 1.000000e+00 : f32
    %157 = vector.broadcast %cst_40 : f32 to vector<2x32xf32>
    %158 = arith.addf %157, %156 : vector<2x32xf32>
    %159 = arith.divf %157, %158 : vector<2x32xf32>
    %160 = vector.extract_strided_slice %147 {offsets = [0, 64], sizes = [2, 32], strides = [1, 1]} : vector<2x128xf32> to vector<2x32xf32>
    %161 = math.tanh %160 : vector<2x32xf32>
    %162 = vector.extract_strided_slice %147 {offsets = [0, 96], sizes = [2, 32], strides = [1, 1]} : vector<2x128xf32> to vector<2x32xf32>
    %163 = arith.negf %162 : vector<2x32xf32>
    %164 = math.exp %163 : vector<2x32xf32>
    %cst_41 = arith.constant 1.000000e+00 : f32
    %165 = vector.broadcast %cst_41 : f32 to vector<2x32xf32>
    %166 = arith.addf %165, %164 : vector<2x32xf32>
    %167 = arith.divf %165, %166 : vector<2x32xf32>
    %168 = arith.mulf %159, %109 : vector<2x32xf32>
    %169 = arith.mulf %153, %161 : vector<2x32xf32>
    %170 = arith.addf %168, %169 : vector<2x32xf32>
    %171 = math.tanh %170 : vector<2x32xf32>
    %172 = arith.mulf %167, %171 : vector<2x32xf32>
    %173 = arith.truncf %172 : vector<2x32xf32> to vector<2x32xbf16>
    %cst_42 = arith.constant dense<0.000000e+00> : vector<2x128xf32>
    %174 = tpu.matmul %173, %12, %cst_42 {dimension_numbers = #tpu.dot_dimension_numbers<[1], [0], [0], [1], [0, 0, 1, 1], [], []>} : vector<2x32xbf16>, vector<32x128xbf16>, vector<2x128xf32> -> vector<2x128xf32>
    %175 = arith.truncf %143 : vector<2x32xf32> to vector<2x32xbf16>
    %cst_43 = arith.constant dense<0.000000e+00> : vector<2x128xf32>
    %176 = tpu.matmul %175, %13, %cst_43 {dimension_numbers = #tpu.dot_dimension_numbers<[1], [0], [0], [1], [0, 0, 1, 1], [], []>} : vector<2x32xbf16>, vector<32x128xbf16>, vector<2x128xf32> -> vector<2x128xf32>
    %177 = arith.addf %174, %176 : vector<2x128xf32>
    %178 = vector.broadcast %14 : vector<1x128xf32> to vector<2x128xf32>
    %179 = arith.addf %177, %178 : vector<2x128xf32>
    %180 = vector.extract_strided_slice %179 {offsets = [0, 0], sizes = [2, 32], strides = [1, 1]} : vector<2x128xf32> to vector<2x32xf32>
    %181 = arith.negf %180 : vector<2x32xf32>
    %182 = math.exp %181 : vector<2x32xf32>
    %cst_44 = arith.constant 1.000000e+00 : f32
    %183 = vector.broadcast %cst_44 : f32 to vector<2x32xf32>
    %184 = arith.addf %183, %182 : vector<2x32xf32>
    %185 = arith.divf %183, %184 : vector<2x32xf32>
    %186 = vector.extract_strided_slice %179 {offsets = [0, 32], sizes = [2, 32], strides = [1, 1]} : vector<2x128xf32> to vector<2x32xf32>
    %187 = arith.negf %186 : vector<2x32xf32>
    %188 = math.exp %187 : vector<2x32xf32>
    %cst_45 = arith.constant 1.000000e+00 : f32
    %189 = vector.broadcast %cst_45 : f32 to vector<2x32xf32>
    %190 = arith.addf %189, %188 : vector<2x32xf32>
    %191 = arith.divf %189, %190 : vector<2x32xf32>
    %192 = vector.extract_strided_slice %179 {offsets = [0, 64], sizes = [2, 32], strides = [1, 1]} : vector<2x128xf32> to vector<2x32xf32>
    %193 = math.tanh %192 : vector<2x32xf32>
    %194 = vector.extract_strided_slice %179 {offsets = [0, 96], sizes = [2, 32], strides = [1, 1]} : vector<2x128xf32> to vector<2x32xf32>
    %195 = arith.negf %194 : vector<2x32xf32>
    %196 = math.exp %195 : vector<2x32xf32>
    %cst_46 = arith.constant 1.000000e+00 : f32
    %197 = vector.broadcast %cst_46 : f32 to vector<2x32xf32>
    %198 = arith.addf %197, %196 : vector<2x32xf32>
    %199 = arith.divf %197, %198 : vector<2x32xf32>
    %200 = arith.mulf %191, %141 : vector<2x32xf32>
    %201 = arith.mulf %185, %193 : vector<2x32xf32>
    %202 = arith.addf %200, %201 : vector<2x32xf32>
    %203 = math.tanh %202 : vector<2x32xf32>
    %204 = arith.mulf %199, %203 : vector<2x32xf32>
    %205 = vector.extract_strided_slice %21 {offsets = [6, 0], sizes = [2, 128], strides = [1, 1]} : vector<16x128xf32> to vector<2x128xf32>
    %206 = arith.truncf %172 : vector<2x32xf32> to vector<2x32xbf16>
    %cst_47 = arith.constant dense<0.000000e+00> : vector<2x128xf32>
    %207 = tpu.matmul %206, %11, %cst_47 {dimension_numbers = #tpu.dot_dimension_numbers<[1], [0], [0], [1], [0, 0, 1, 1], [], []>} : vector<2x32xbf16>, vector<32x128xbf16>, vector<2x128xf32> -> vector<2x128xf32>
    %208 = arith.addf %205, %207 : vector<2x128xf32>
    %209 = vector.extract_strided_slice %208 {offsets = [0, 0], sizes = [2, 32], strides = [1, 1]} : vector<2x128xf32> to vector<2x32xf32>
    %210 = arith.negf %209 : vector<2x32xf32>
    %211 = math.exp %210 : vector<2x32xf32>
    %cst_48 = arith.constant 1.000000e+00 : f32
    %212 = vector.broadcast %cst_48 : f32 to vector<2x32xf32>
    %213 = arith.addf %212, %211 : vector<2x32xf32>
    %214 = arith.divf %212, %213 : vector<2x32xf32>
    %215 = vector.extract_strided_slice %208 {offsets = [0, 32], sizes = [2, 32], strides = [1, 1]} : vector<2x128xf32> to vector<2x32xf32>
    %216 = arith.negf %215 : vector<2x32xf32>
    %217 = math.exp %216 : vector<2x32xf32>
    %cst_49 = arith.constant 1.000000e+00 : f32
    %218 = vector.broadcast %cst_49 : f32 to vector<2x32xf32>
    %219 = arith.addf %218, %217 : vector<2x32xf32>
    %220 = arith.divf %218, %219 : vector<2x32xf32>
    %221 = vector.extract_strided_slice %208 {offsets = [0, 64], sizes = [2, 32], strides = [1, 1]} : vector<2x128xf32> to vector<2x32xf32>
    %222 = math.tanh %221 : vector<2x32xf32>
    %223 = vector.extract_strided_slice %208 {offsets = [0, 96], sizes = [2, 32], strides = [1, 1]} : vector<2x128xf32> to vector<2x32xf32>
    %224 = arith.negf %223 : vector<2x32xf32>
    %225 = math.exp %224 : vector<2x32xf32>
    %cst_50 = arith.constant 1.000000e+00 : f32
    %226 = vector.broadcast %cst_50 : f32 to vector<2x32xf32>
    %227 = arith.addf %226, %225 : vector<2x32xf32>
    %228 = arith.divf %226, %227 : vector<2x32xf32>
    %229 = arith.mulf %220, %170 : vector<2x32xf32>
    %230 = arith.mulf %214, %222 : vector<2x32xf32>
    %231 = arith.addf %229, %230 : vector<2x32xf32>
    %232 = math.tanh %231 : vector<2x32xf32>
    %233 = arith.mulf %228, %232 : vector<2x32xf32>
    %234 = arith.truncf %233 : vector<2x32xf32> to vector<2x32xbf16>
    %cst_51 = arith.constant dense<0.000000e+00> : vector<2x128xf32>
    %235 = tpu.matmul %234, %12, %cst_51 {dimension_numbers = #tpu.dot_dimension_numbers<[1], [0], [0], [1], [0, 0, 1, 1], [], []>} : vector<2x32xbf16>, vector<32x128xbf16>, vector<2x128xf32> -> vector<2x128xf32>
    %236 = arith.truncf %204 : vector<2x32xf32> to vector<2x32xbf16>
    %cst_52 = arith.constant dense<0.000000e+00> : vector<2x128xf32>
    %237 = tpu.matmul %236, %13, %cst_52 {dimension_numbers = #tpu.dot_dimension_numbers<[1], [0], [0], [1], [0, 0, 1, 1], [], []>} : vector<2x32xbf16>, vector<32x128xbf16>, vector<2x128xf32> -> vector<2x128xf32>
    %238 = arith.addf %235, %237 : vector<2x128xf32>
    %239 = vector.broadcast %14 : vector<1x128xf32> to vector<2x128xf32>
    %240 = arith.addf %238, %239 : vector<2x128xf32>
    %241 = vector.extract_strided_slice %240 {offsets = [0, 0], sizes = [2, 32], strides = [1, 1]} : vector<2x128xf32> to vector<2x32xf32>
    %242 = arith.negf %241 : vector<2x32xf32>
    %243 = math.exp %242 : vector<2x32xf32>
    %cst_53 = arith.constant 1.000000e+00 : f32
    %244 = vector.broadcast %cst_53 : f32 to vector<2x32xf32>
    %245 = arith.addf %244, %243 : vector<2x32xf32>
    %246 = arith.divf %244, %245 : vector<2x32xf32>
    %247 = vector.extract_strided_slice %240 {offsets = [0, 32], sizes = [2, 32], strides = [1, 1]} : vector<2x128xf32> to vector<2x32xf32>
    %248 = arith.negf %247 : vector<2x32xf32>
    %249 = math.exp %248 : vector<2x32xf32>
    %cst_54 = arith.constant 1.000000e+00 : f32
    %250 = vector.broadcast %cst_54 : f32 to vector<2x32xf32>
    %251 = arith.addf %250, %249 : vector<2x32xf32>
    %252 = arith.divf %250, %251 : vector<2x32xf32>
    %253 = vector.extract_strided_slice %240 {offsets = [0, 64], sizes = [2, 32], strides = [1, 1]} : vector<2x128xf32> to vector<2x32xf32>
    %254 = math.tanh %253 : vector<2x32xf32>
    %255 = vector.extract_strided_slice %240 {offsets = [0, 96], sizes = [2, 32], strides = [1, 1]} : vector<2x128xf32> to vector<2x32xf32>
    %256 = arith.negf %255 : vector<2x32xf32>
    %257 = math.exp %256 : vector<2x32xf32>
    %cst_55 = arith.constant 1.000000e+00 : f32
    %258 = vector.broadcast %cst_55 : f32 to vector<2x32xf32>
    %259 = arith.addf %258, %257 : vector<2x32xf32>
    %260 = arith.divf %258, %259 : vector<2x32xf32>
    %261 = arith.mulf %252, %202 : vector<2x32xf32>
    %262 = arith.mulf %246, %254 : vector<2x32xf32>
    %263 = arith.addf %261, %262 : vector<2x32xf32>
    %264 = math.tanh %263 : vector<2x32xf32>
    %265 = arith.mulf %260, %264 : vector<2x32xf32>
    %266 = vector.extract_strided_slice %21 {offsets = [8, 0], sizes = [2, 128], strides = [1, 1]} : vector<16x128xf32> to vector<2x128xf32>
    %267 = arith.truncf %233 : vector<2x32xf32> to vector<2x32xbf16>
    %cst_56 = arith.constant dense<0.000000e+00> : vector<2x128xf32>
    %268 = tpu.matmul %267, %11, %cst_56 {dimension_numbers = #tpu.dot_dimension_numbers<[1], [0], [0], [1], [0, 0, 1, 1], [], []>} : vector<2x32xbf16>, vector<32x128xbf16>, vector<2x128xf32> -> vector<2x128xf32>
    %269 = arith.addf %266, %268 : vector<2x128xf32>
    %270 = vector.extract_strided_slice %269 {offsets = [0, 0], sizes = [2, 32], strides = [1, 1]} : vector<2x128xf32> to vector<2x32xf32>
    %271 = arith.negf %270 : vector<2x32xf32>
    %272 = math.exp %271 : vector<2x32xf32>
    %cst_57 = arith.constant 1.000000e+00 : f32
    %273 = vector.broadcast %cst_57 : f32 to vector<2x32xf32>
    %274 = arith.addf %273, %272 : vector<2x32xf32>
    %275 = arith.divf %273, %274 : vector<2x32xf32>
    %276 = vector.extract_strided_slice %269 {offsets = [0, 32], sizes = [2, 32], strides = [1, 1]} : vector<2x128xf32> to vector<2x32xf32>
    %277 = arith.negf %276 : vector<2x32xf32>
    %278 = math.exp %277 : vector<2x32xf32>
    %cst_58 = arith.constant 1.000000e+00 : f32
    %279 = vector.broadcast %cst_58 : f32 to vector<2x32xf32>
    %280 = arith.addf %279, %278 : vector<2x32xf32>
    %281 = arith.divf %279, %280 : vector<2x32xf32>
    %282 = vector.extract_strided_slice %269 {offsets = [0, 64], sizes = [2, 32], strides = [1, 1]} : vector<2x128xf32> to vector<2x32xf32>
    %283 = math.tanh %282 : vector<2x32xf32>
    %284 = vector.extract_strided_slice %269 {offsets = [0, 96], sizes = [2, 32], strides = [1, 1]} : vector<2x128xf32> to vector<2x32xf32>
    %285 = arith.negf %284 : vector<2x32xf32>
    %286 = math.exp %285 : vector<2x32xf32>
    %cst_59 = arith.constant 1.000000e+00 : f32
    %287 = vector.broadcast %cst_59 : f32 to vector<2x32xf32>
    %288 = arith.addf %287, %286 : vector<2x32xf32>
    %289 = arith.divf %287, %288 : vector<2x32xf32>
    %290 = arith.mulf %281, %231 : vector<2x32xf32>
    %291 = arith.mulf %275, %283 : vector<2x32xf32>
    %292 = arith.addf %290, %291 : vector<2x32xf32>
    %293 = math.tanh %292 : vector<2x32xf32>
    %294 = arith.mulf %289, %293 : vector<2x32xf32>
    %295 = arith.truncf %294 : vector<2x32xf32> to vector<2x32xbf16>
    %cst_60 = arith.constant dense<0.000000e+00> : vector<2x128xf32>
    %296 = tpu.matmul %295, %12, %cst_60 {dimension_numbers = #tpu.dot_dimension_numbers<[1], [0], [0], [1], [0, 0, 1, 1], [], []>} : vector<2x32xbf16>, vector<32x128xbf16>, vector<2x128xf32> -> vector<2x128xf32>
    %297 = arith.truncf %265 : vector<2x32xf32> to vector<2x32xbf16>
    %cst_61 = arith.constant dense<0.000000e+00> : vector<2x128xf32>
    %298 = tpu.matmul %297, %13, %cst_61 {dimension_numbers = #tpu.dot_dimension_numbers<[1], [0], [0], [1], [0, 0, 1, 1], [], []>} : vector<2x32xbf16>, vector<32x128xbf16>, vector<2x128xf32> -> vector<2x128xf32>
    %299 = arith.addf %296, %298 : vector<2x128xf32>
    %300 = vector.broadcast %14 : vector<1x128xf32> to vector<2x128xf32>
    %301 = arith.addf %299, %300 : vector<2x128xf32>
    %302 = vector.extract_strided_slice %301 {offsets = [0, 0], sizes = [2, 32], strides = [1, 1]} : vector<2x128xf32> to vector<2x32xf32>
    %303 = arith.negf %302 : vector<2x32xf32>
    %304 = math.exp %303 : vector<2x32xf32>
    %cst_62 = arith.constant 1.000000e+00 : f32
    %305 = vector.broadcast %cst_62 : f32 to vector<2x32xf32>
    %306 = arith.addf %305, %304 : vector<2x32xf32>
    %307 = arith.divf %305, %306 : vector<2x32xf32>
    %308 = vector.extract_strided_slice %301 {offsets = [0, 32], sizes = [2, 32], strides = [1, 1]} : vector<2x128xf32> to vector<2x32xf32>
    %309 = arith.negf %308 : vector<2x32xf32>
    %310 = math.exp %309 : vector<2x32xf32>
    %cst_63 = arith.constant 1.000000e+00 : f32
    %311 = vector.broadcast %cst_63 : f32 to vector<2x32xf32>
    %312 = arith.addf %311, %310 : vector<2x32xf32>
    %313 = arith.divf %311, %312 : vector<2x32xf32>
    %314 = vector.extract_strided_slice %301 {offsets = [0, 64], sizes = [2, 32], strides = [1, 1]} : vector<2x128xf32> to vector<2x32xf32>
    %315 = math.tanh %314 : vector<2x32xf32>
    %316 = vector.extract_strided_slice %301 {offsets = [0, 96], sizes = [2, 32], strides = [1, 1]} : vector<2x128xf32> to vector<2x32xf32>
    %317 = arith.negf %316 : vector<2x32xf32>
    %318 = math.exp %317 : vector<2x32xf32>
    %cst_64 = arith.constant 1.000000e+00 : f32
    %319 = vector.broadcast %cst_64 : f32 to vector<2x32xf32>
    %320 = arith.addf %319, %318 : vector<2x32xf32>
    %321 = arith.divf %319, %320 : vector<2x32xf32>
    %322 = arith.mulf %313, %263 : vector<2x32xf32>
    %323 = arith.mulf %307, %315 : vector<2x32xf32>
    %324 = arith.addf %322, %323 : vector<2x32xf32>
    %325 = math.tanh %324 : vector<2x32xf32>
    %326 = arith.mulf %321, %325 : vector<2x32xf32>
    %327 = vector.extract_strided_slice %21 {offsets = [10, 0], sizes = [2, 128], strides = [1, 1]} : vector<16x128xf32> to vector<2x128xf32>
    %328 = arith.truncf %294 : vector<2x32xf32> to vector<2x32xbf16>
    %cst_65 = arith.constant dense<0.000000e+00> : vector<2x128xf32>
    %329 = tpu.matmul %328, %11, %cst_65 {dimension_numbers = #tpu.dot_dimension_numbers<[1], [0], [0], [1], [0, 0, 1, 1], [], []>} : vector<2x32xbf16>, vector<32x128xbf16>, vector<2x128xf32> -> vector<2x128xf32>
    %330 = arith.addf %327, %329 : vector<2x128xf32>
    %331 = vector.extract_strided_slice %330 {offsets = [0, 0], sizes = [2, 32], strides = [1, 1]} : vector<2x128xf32> to vector<2x32xf32>
    %332 = arith.negf %331 : vector<2x32xf32>
    %333 = math.exp %332 : vector<2x32xf32>
    %cst_66 = arith.constant 1.000000e+00 : f32
    %334 = vector.broadcast %cst_66 : f32 to vector<2x32xf32>
    %335 = arith.addf %334, %333 : vector<2x32xf32>
    %336 = arith.divf %334, %335 : vector<2x32xf32>
    %337 = vector.extract_strided_slice %330 {offsets = [0, 32], sizes = [2, 32], strides = [1, 1]} : vector<2x128xf32> to vector<2x32xf32>
    %338 = arith.negf %337 : vector<2x32xf32>
    %339 = math.exp %338 : vector<2x32xf32>
    %cst_67 = arith.constant 1.000000e+00 : f32
    %340 = vector.broadcast %cst_67 : f32 to vector<2x32xf32>
    %341 = arith.addf %340, %339 : vector<2x32xf32>
    %342 = arith.divf %340, %341 : vector<2x32xf32>
    %343 = vector.extract_strided_slice %330 {offsets = [0, 64], sizes = [2, 32], strides = [1, 1]} : vector<2x128xf32> to vector<2x32xf32>
    %344 = math.tanh %343 : vector<2x32xf32>
    %345 = vector.extract_strided_slice %330 {offsets = [0, 96], sizes = [2, 32], strides = [1, 1]} : vector<2x128xf32> to vector<2x32xf32>
    %346 = arith.negf %345 : vector<2x32xf32>
    %347 = math.exp %346 : vector<2x32xf32>
    %cst_68 = arith.constant 1.000000e+00 : f32
    %348 = vector.broadcast %cst_68 : f32 to vector<2x32xf32>
    %349 = arith.addf %348, %347 : vector<2x32xf32>
    %350 = arith.divf %348, %349 : vector<2x32xf32>
    %351 = arith.mulf %342, %292 : vector<2x32xf32>
    %352 = arith.mulf %336, %344 : vector<2x32xf32>
    %353 = arith.addf %351, %352 : vector<2x32xf32>
    %354 = math.tanh %353 : vector<2x32xf32>
    %355 = arith.mulf %350, %354 : vector<2x32xf32>
    %356 = arith.truncf %355 : vector<2x32xf32> to vector<2x32xbf16>
    %cst_69 = arith.constant dense<0.000000e+00> : vector<2x128xf32>
    %357 = tpu.matmul %356, %12, %cst_69 {dimension_numbers = #tpu.dot_dimension_numbers<[1], [0], [0], [1], [0, 0, 1, 1], [], []>} : vector<2x32xbf16>, vector<32x128xbf16>, vector<2x128xf32> -> vector<2x128xf32>
    %358 = arith.truncf %326 : vector<2x32xf32> to vector<2x32xbf16>
    %cst_70 = arith.constant dense<0.000000e+00> : vector<2x128xf32>
    %359 = tpu.matmul %358, %13, %cst_70 {dimension_numbers = #tpu.dot_dimension_numbers<[1], [0], [0], [1], [0, 0, 1, 1], [], []>} : vector<2x32xbf16>, vector<32x128xbf16>, vector<2x128xf32> -> vector<2x128xf32>
    %360 = arith.addf %357, %359 : vector<2x128xf32>
    %361 = vector.broadcast %14 : vector<1x128xf32> to vector<2x128xf32>
    %362 = arith.addf %360, %361 : vector<2x128xf32>
    %363 = vector.extract_strided_slice %362 {offsets = [0, 0], sizes = [2, 32], strides = [1, 1]} : vector<2x128xf32> to vector<2x32xf32>
    %364 = arith.negf %363 : vector<2x32xf32>
    %365 = math.exp %364 : vector<2x32xf32>
    %cst_71 = arith.constant 1.000000e+00 : f32
    %366 = vector.broadcast %cst_71 : f32 to vector<2x32xf32>
    %367 = arith.addf %366, %365 : vector<2x32xf32>
    %368 = arith.divf %366, %367 : vector<2x32xf32>
    %369 = vector.extract_strided_slice %362 {offsets = [0, 32], sizes = [2, 32], strides = [1, 1]} : vector<2x128xf32> to vector<2x32xf32>
    %370 = arith.negf %369 : vector<2x32xf32>
    %371 = math.exp %370 : vector<2x32xf32>
    %cst_72 = arith.constant 1.000000e+00 : f32
    %372 = vector.broadcast %cst_72 : f32 to vector<2x32xf32>
    %373 = arith.addf %372, %371 : vector<2x32xf32>
    %374 = arith.divf %372, %373 : vector<2x32xf32>
    %375 = vector.extract_strided_slice %362 {offsets = [0, 64], sizes = [2, 32], strides = [1, 1]} : vector<2x128xf32> to vector<2x32xf32>
    %376 = math.tanh %375 : vector<2x32xf32>
    %377 = vector.extract_strided_slice %362 {offsets = [0, 96], sizes = [2, 32], strides = [1, 1]} : vector<2x128xf32> to vector<2x32xf32>
    %378 = arith.negf %377 : vector<2x32xf32>
    %379 = math.exp %378 : vector<2x32xf32>
    %cst_73 = arith.constant 1.000000e+00 : f32
    %380 = vector.broadcast %cst_73 : f32 to vector<2x32xf32>
    %381 = arith.addf %380, %379 : vector<2x32xf32>
    %382 = arith.divf %380, %381 : vector<2x32xf32>
    %383 = arith.mulf %374, %324 : vector<2x32xf32>
    %384 = arith.mulf %368, %376 : vector<2x32xf32>
    %385 = arith.addf %383, %384 : vector<2x32xf32>
    %386 = math.tanh %385 : vector<2x32xf32>
    %387 = arith.mulf %382, %386 : vector<2x32xf32>
    %388 = vector.extract_strided_slice %21 {offsets = [12, 0], sizes = [2, 128], strides = [1, 1]} : vector<16x128xf32> to vector<2x128xf32>
    %389 = arith.truncf %355 : vector<2x32xf32> to vector<2x32xbf16>
    %cst_74 = arith.constant dense<0.000000e+00> : vector<2x128xf32>
    %390 = tpu.matmul %389, %11, %cst_74 {dimension_numbers = #tpu.dot_dimension_numbers<[1], [0], [0], [1], [0, 0, 1, 1], [], []>} : vector<2x32xbf16>, vector<32x128xbf16>, vector<2x128xf32> -> vector<2x128xf32>
    %391 = arith.addf %388, %390 : vector<2x128xf32>
    %392 = vector.extract_strided_slice %391 {offsets = [0, 0], sizes = [2, 32], strides = [1, 1]} : vector<2x128xf32> to vector<2x32xf32>
    %393 = arith.negf %392 : vector<2x32xf32>
    %394 = math.exp %393 : vector<2x32xf32>
    %cst_75 = arith.constant 1.000000e+00 : f32
    %395 = vector.broadcast %cst_75 : f32 to vector<2x32xf32>
    %396 = arith.addf %395, %394 : vector<2x32xf32>
    %397 = arith.divf %395, %396 : vector<2x32xf32>
    %398 = vector.extract_strided_slice %391 {offsets = [0, 32], sizes = [2, 32], strides = [1, 1]} : vector<2x128xf32> to vector<2x32xf32>
    %399 = arith.negf %398 : vector<2x32xf32>
    %400 = math.exp %399 : vector<2x32xf32>
    %cst_76 = arith.constant 1.000000e+00 : f32
    %401 = vector.broadcast %cst_76 : f32 to vector<2x32xf32>
    %402 = arith.addf %401, %400 : vector<2x32xf32>
    %403 = arith.divf %401, %402 : vector<2x32xf32>
    %404 = vector.extract_strided_slice %391 {offsets = [0, 64], sizes = [2, 32], strides = [1, 1]} : vector<2x128xf32> to vector<2x32xf32>
    %405 = math.tanh %404 : vector<2x32xf32>
    %406 = vector.extract_strided_slice %391 {offsets = [0, 96], sizes = [2, 32], strides = [1, 1]} : vector<2x128xf32> to vector<2x32xf32>
    %407 = arith.negf %406 : vector<2x32xf32>
    %408 = math.exp %407 : vector<2x32xf32>
    %cst_77 = arith.constant 1.000000e+00 : f32
    %409 = vector.broadcast %cst_77 : f32 to vector<2x32xf32>
    %410 = arith.addf %409, %408 : vector<2x32xf32>
    %411 = arith.divf %409, %410 : vector<2x32xf32>
    %412 = arith.mulf %403, %353 : vector<2x32xf32>
    %413 = arith.mulf %397, %405 : vector<2x32xf32>
    %414 = arith.addf %412, %413 : vector<2x32xf32>
    %415 = math.tanh %414 : vector<2x32xf32>
    %416 = arith.mulf %411, %415 : vector<2x32xf32>
    %417 = arith.truncf %416 : vector<2x32xf32> to vector<2x32xbf16>
    %cst_78 = arith.constant dense<0.000000e+00> : vector<2x128xf32>
    %418 = tpu.matmul %417, %12, %cst_78 {dimension_numbers = #tpu.dot_dimension_numbers<[1], [0], [0], [1], [0, 0, 1, 1], [], []>} : vector<2x32xbf16>, vector<32x128xbf16>, vector<2x128xf32> -> vector<2x128xf32>
    %419 = arith.truncf %387 : vector<2x32xf32> to vector<2x32xbf16>
    %cst_79 = arith.constant dense<0.000000e+00> : vector<2x128xf32>
    %420 = tpu.matmul %419, %13, %cst_79 {dimension_numbers = #tpu.dot_dimension_numbers<[1], [0], [0], [1], [0, 0, 1, 1], [], []>} : vector<2x32xbf16>, vector<32x128xbf16>, vector<2x128xf32> -> vector<2x128xf32>
    %421 = arith.addf %418, %420 : vector<2x128xf32>
    %422 = vector.broadcast %14 : vector<1x128xf32> to vector<2x128xf32>
    %423 = arith.addf %421, %422 : vector<2x128xf32>
    %424 = vector.extract_strided_slice %423 {offsets = [0, 0], sizes = [2, 32], strides = [1, 1]} : vector<2x128xf32> to vector<2x32xf32>
    %425 = arith.negf %424 : vector<2x32xf32>
    %426 = math.exp %425 : vector<2x32xf32>
    %cst_80 = arith.constant 1.000000e+00 : f32
    %427 = vector.broadcast %cst_80 : f32 to vector<2x32xf32>
    %428 = arith.addf %427, %426 : vector<2x32xf32>
    %429 = arith.divf %427, %428 : vector<2x32xf32>
    %430 = vector.extract_strided_slice %423 {offsets = [0, 32], sizes = [2, 32], strides = [1, 1]} : vector<2x128xf32> to vector<2x32xf32>
    %431 = arith.negf %430 : vector<2x32xf32>
    %432 = math.exp %431 : vector<2x32xf32>
    %cst_81 = arith.constant 1.000000e+00 : f32
    %433 = vector.broadcast %cst_81 : f32 to vector<2x32xf32>
    %434 = arith.addf %433, %432 : vector<2x32xf32>
    %435 = arith.divf %433, %434 : vector<2x32xf32>
    %436 = vector.extract_strided_slice %423 {offsets = [0, 64], sizes = [2, 32], strides = [1, 1]} : vector<2x128xf32> to vector<2x32xf32>
    %437 = math.tanh %436 : vector<2x32xf32>
    %438 = vector.extract_strided_slice %423 {offsets = [0, 96], sizes = [2, 32], strides = [1, 1]} : vector<2x128xf32> to vector<2x32xf32>
    %439 = arith.negf %438 : vector<2x32xf32>
    %440 = math.exp %439 : vector<2x32xf32>
    %cst_82 = arith.constant 1.000000e+00 : f32
    %441 = vector.broadcast %cst_82 : f32 to vector<2x32xf32>
    %442 = arith.addf %441, %440 : vector<2x32xf32>
    %443 = arith.divf %441, %442 : vector<2x32xf32>
    %444 = arith.mulf %435, %385 : vector<2x32xf32>
    %445 = arith.mulf %429, %437 : vector<2x32xf32>
    %446 = arith.addf %444, %445 : vector<2x32xf32>
    %447 = math.tanh %446 : vector<2x32xf32>
    %448 = arith.mulf %443, %447 : vector<2x32xf32>
    %449 = vector.extract_strided_slice %21 {offsets = [14, 0], sizes = [2, 128], strides = [1, 1]} : vector<16x128xf32> to vector<2x128xf32>
    %450 = arith.truncf %416 : vector<2x32xf32> to vector<2x32xbf16>
    %cst_83 = arith.constant dense<0.000000e+00> : vector<2x128xf32>
    %451 = tpu.matmul %450, %11, %cst_83 {dimension_numbers = #tpu.dot_dimension_numbers<[1], [0], [0], [1], [0, 0, 1, 1], [], []>} : vector<2x32xbf16>, vector<32x128xbf16>, vector<2x128xf32> -> vector<2x128xf32>
    %452 = arith.addf %449, %451 : vector<2x128xf32>
    %453 = vector.extract_strided_slice %452 {offsets = [0, 0], sizes = [2, 32], strides = [1, 1]} : vector<2x128xf32> to vector<2x32xf32>
    %454 = arith.negf %453 : vector<2x32xf32>
    %455 = math.exp %454 : vector<2x32xf32>
    %cst_84 = arith.constant 1.000000e+00 : f32
    %456 = vector.broadcast %cst_84 : f32 to vector<2x32xf32>
    %457 = arith.addf %456, %455 : vector<2x32xf32>
    %458 = arith.divf %456, %457 : vector<2x32xf32>
    %459 = vector.extract_strided_slice %452 {offsets = [0, 32], sizes = [2, 32], strides = [1, 1]} : vector<2x128xf32> to vector<2x32xf32>
    %460 = arith.negf %459 : vector<2x32xf32>
    %461 = math.exp %460 : vector<2x32xf32>
    %cst_85 = arith.constant 1.000000e+00 : f32
    %462 = vector.broadcast %cst_85 : f32 to vector<2x32xf32>
    %463 = arith.addf %462, %461 : vector<2x32xf32>
    %464 = arith.divf %462, %463 : vector<2x32xf32>
    %465 = vector.extract_strided_slice %452 {offsets = [0, 64], sizes = [2, 32], strides = [1, 1]} : vector<2x128xf32> to vector<2x32xf32>
    %466 = math.tanh %465 : vector<2x32xf32>
    %467 = vector.extract_strided_slice %452 {offsets = [0, 96], sizes = [2, 32], strides = [1, 1]} : vector<2x128xf32> to vector<2x32xf32>
    %468 = arith.negf %467 : vector<2x32xf32>
    %469 = math.exp %468 : vector<2x32xf32>
    %cst_86 = arith.constant 1.000000e+00 : f32
    %470 = vector.broadcast %cst_86 : f32 to vector<2x32xf32>
    %471 = arith.addf %470, %469 : vector<2x32xf32>
    %472 = arith.divf %470, %471 : vector<2x32xf32>
    %473 = arith.mulf %464, %414 : vector<2x32xf32>
    %474 = arith.mulf %458, %466 : vector<2x32xf32>
    %475 = arith.addf %473, %474 : vector<2x32xf32>
    %476 = math.tanh %475 : vector<2x32xf32>
    %477 = arith.mulf %472, %476 : vector<2x32xf32>
    %478 = arith.truncf %477 : vector<2x32xf32> to vector<2x32xbf16>
    %cst_87 = arith.constant dense<0.000000e+00> : vector<2x128xf32>
    %479 = tpu.matmul %478, %12, %cst_87 {dimension_numbers = #tpu.dot_dimension_numbers<[1], [0], [0], [1], [0, 0, 1, 1], [], []>} : vector<2x32xbf16>, vector<32x128xbf16>, vector<2x128xf32> -> vector<2x128xf32>
    %480 = arith.truncf %448 : vector<2x32xf32> to vector<2x32xbf16>
    %cst_88 = arith.constant dense<0.000000e+00> : vector<2x128xf32>
    %481 = tpu.matmul %480, %13, %cst_88 {dimension_numbers = #tpu.dot_dimension_numbers<[1], [0], [0], [1], [0, 0, 1, 1], [], []>} : vector<2x32xbf16>, vector<32x128xbf16>, vector<2x128xf32> -> vector<2x128xf32>
    %482 = arith.addf %479, %481 : vector<2x128xf32>
    %483 = vector.broadcast %14 : vector<1x128xf32> to vector<2x128xf32>
    %484 = arith.addf %482, %483 : vector<2x128xf32>
    %485 = vector.extract_strided_slice %484 {offsets = [0, 0], sizes = [2, 32], strides = [1, 1]} : vector<2x128xf32> to vector<2x32xf32>
    %486 = arith.negf %485 : vector<2x32xf32>
    %487 = math.exp %486 : vector<2x32xf32>
    %cst_89 = arith.constant 1.000000e+00 : f32
    %488 = vector.broadcast %cst_89 : f32 to vector<2x32xf32>
    %489 = arith.addf %488, %487 : vector<2x32xf32>
    %490 = arith.divf %488, %489 : vector<2x32xf32>
    %491 = vector.extract_strided_slice %484 {offsets = [0, 32], sizes = [2, 32], strides = [1, 1]} : vector<2x128xf32> to vector<2x32xf32>
    %492 = arith.negf %491 : vector<2x32xf32>
    %493 = math.exp %492 : vector<2x32xf32>
    %cst_90 = arith.constant 1.000000e+00 : f32
    %494 = vector.broadcast %cst_90 : f32 to vector<2x32xf32>
    %495 = arith.addf %494, %493 : vector<2x32xf32>
    %496 = arith.divf %494, %495 : vector<2x32xf32>
    %497 = vector.extract_strided_slice %484 {offsets = [0, 64], sizes = [2, 32], strides = [1, 1]} : vector<2x128xf32> to vector<2x32xf32>
    %498 = math.tanh %497 : vector<2x32xf32>
    %499 = vector.extract_strided_slice %484 {offsets = [0, 96], sizes = [2, 32], strides = [1, 1]} : vector<2x128xf32> to vector<2x32xf32>
    %500 = arith.negf %499 : vector<2x32xf32>
    %501 = math.exp %500 : vector<2x32xf32>
    %cst_91 = arith.constant 1.000000e+00 : f32
    %502 = vector.broadcast %cst_91 : f32 to vector<2x32xf32>
    %503 = arith.addf %502, %501 : vector<2x32xf32>
    %504 = arith.divf %502, %503 : vector<2x32xf32>
    %505 = arith.mulf %496, %446 : vector<2x32xf32>
    %506 = arith.mulf %490, %498 : vector<2x32xf32>
    %507 = arith.addf %505, %506 : vector<2x32xf32>
    %508 = math.tanh %507 : vector<2x32xf32>
    %509 = arith.mulf %504, %508 : vector<2x32xf32>
    %c0_92 = arith.constant 0 : index
    %c0_93 = arith.constant 0 : index
    %c0_94 = arith.constant 0 : index
    %510 = vector.load %arg13[%c0_92, %c0_93, %c0_94] : memref<2x2x32xf32, #tpu.memory_space<vmem>>, vector<1x2x32xf32>
    %511 = vector.shape_cast %510 : vector<1x2x32xf32> to vector<2x32xf32>
    %512 = vector.shape_cast %477 : vector<2x32xf32> to vector<1x2x32xf32>
    tpu.vector_store %arg13[%c0_92, %c0_93, %c0_94], %512 {strides = array<i32>} : memref<2x2x32xf32, #tpu.memory_space<vmem>>, vector<1x2x32xf32>,
    %c1 = arith.constant 1 : index
    %c0_95 = arith.constant 0 : index
    %c0_96 = arith.constant 0 : index
    %513 = vector.load %arg13[%c1, %c0_95, %c0_96] : memref<2x2x32xf32, #tpu.memory_space<vmem>>, vector<1x2x32xf32>
    %514 = vector.shape_cast %513 : vector<1x2x32xf32> to vector<2x32xf32>
    %515 = vector.shape_cast %509 : vector<2x32xf32> to vector<1x2x32xf32>
    tpu.vector_store %arg13[%c1, %c0_95, %c0_96], %515 {strides = array<i32>} : memref<2x2x32xf32, #tpu.memory_space<vmem>>, vector<1x2x32xf32>,
    %c0_97 = arith.constant 0 : index
    %c0_98 = arith.constant 0 : index
    %c0_99 = arith.constant 0 : index
    %516 = vector.load %arg14[%c0_97, %c0_98, %c0_99] : memref<2x2x32xf32, #tpu.memory_space<vmem>>, vector<1x2x32xf32>
    %517 = vector.shape_cast %516 : vector<1x2x32xf32> to vector<2x32xf32>
    %518 = vector.shape_cast %475 : vector<2x32xf32> to vector<1x2x32xf32>
    tpu.vector_store %arg14[%c0_97, %c0_98, %c0_99], %518 {strides = array<i32>} : memref<2x2x32xf32, #tpu.memory_space<vmem>>, vector<1x2x32xf32>,
    %c1_100 = arith.constant 1 : index
    %c0_101 = arith.constant 0 : index
    %c0_102 = arith.constant 0 : index
    %519 = vector.load %arg14[%c1_100, %c0_101, %c0_102] : memref<2x2x32xf32, #tpu.memory_space<vmem>>, vector<1x2x32xf32>
    %520 = vector.shape_cast %519 : vector<1x2x32xf32> to vector<2x32xf32>
    %521 = vector.shape_cast %507 : vector<2x32xf32> to vector<1x2x32xf32>
    tpu.vector_store %arg14[%c1_100, %c0_101, %c0_102], %521 {strides = array<i32>} : memref<2x2x32xf32, #tpu.memory_space<vmem>>, vector<1x2x32xf32>,
    %522 = tpu.concatenate %82, %143, %204, %265, %326, %387, %448, %509 in 0 : vector<2x32xf32>, vector<2x32xf32>, vector<2x32xf32>, vector<2x32xf32>, vector<2x32xf32>, vector<2x32xf32>, vector<2x32xf32>, vector<2x32xf32> -> vector<16x32xf32>
    %c0_103 = arith.constant 0 : index
    %c0_104 = arith.constant 0 : index
    %523 = vector.load %arg10[%c0_103, %c0_104] : memref<32x48xf32, #tpu.memory_space<vmem>>, vector<32x48xf32>
    %cst_105 = arith.constant dense<0.000000e+00> : vector<16x48xf32>
    %524 = tpu.matmul %522, %523, %cst_105 {dimension_numbers = #tpu.dot_dimension_numbers<[1], [0], [0], [1], [0, 0, 1, 1], [], []>} : vector<16x32xf32>, vector<32x48xf32>, vector<16x48xf32> -> vector<16x48xf32>
    %c0_106 = arith.constant 0 : index
    %c0_107 = arith.constant 0 : index
    %525 = vector.load %arg11[%c0_106, %c0_107] : memref<1x48xf32, #tpu.memory_space<vmem>>, vector<1x48xf32>
    %526 = vector.broadcast %525 : vector<1x48xf32> to vector<16x48xf32>
    %527 = arith.addf %524, %526 : vector<16x48xf32>
    %528 = vector.extract_strided_slice %527 {offsets = [0, 0], sizes = [16, 8], strides = [1, 1]} : vector<16x48xf32> to vector<16x8xf32>
    %cst_108 = arith.constant dense<0xFF800000> : vector<16xf32>
    %529 = vector.multi_reduction <maximumf>, %528, %cst_108 [1] : vector<16x8xf32> to vector<16xf32>
    %530 = vector.shape_cast %529 : vector<16xf32> to vector<16x1xf32>
    %531 = vector.broadcast %530 : vector<16x1xf32> to vector<16x8xf32>
    %532 = arith.subf %528, %531 : vector<16x8xf32>
    %533 = math.exp %532 : vector<16x8xf32>
    %cst_109 = arith.constant dense<0.000000e+00> : vector<16xf32>
    %534 = vector.multi_reduction <add>, %533, %cst_109 [1] : vector<16x8xf32> to vector<16xf32>
    %535 = vector.shape_cast %534 : vector<16xf32> to vector<16x1xf32>
    %536 = tpu.reciprocal %535 {approx = true} : vector<16x1xf32> -> vector<16x1xf32>
    %537 = vector.broadcast %536 : vector<16x1xf32> to vector<16x8xf32>
    %538 = arith.mulf %533, %537 : vector<16x8xf32>
    %539 = vector.extract_strided_slice %527 {offsets = [0, 8], sizes = [16, 16], strides = [1, 1]} : vector<16x48xf32> to vector<16x16xf32>
    %540 = vector.extract_strided_slice %527 {offsets = [0, 24], sizes = [16, 16], strides = [1, 1]} : vector<16x48xf32> to vector<16x16xf32>
    %541 = math.exp %540 : vector<16x16xf32>
    %542 = vector.extract_strided_slice %527 {offsets = [0, 40], sizes = [16, 8], strides = [1, 1]} : vector<16x48xf32> to vector<16x8xf32>
    %543 = math.tanh %542 : vector<16x8xf32>
    %544 = tpu.concatenate %538, %539, %541, %543 in 1 : vector<16x8xf32>, vector<16x16xf32>, vector<16x16xf32>, vector<16x8xf32> -> vector<16x48xf32>
    %c0_110 = arith.constant 0 : index
    %c0_111 = arith.constant 0 : index
    %545 = vector.load %arg12[%c0_110, %c0_111] : memref<16x48xf32, #tpu.memory_space<vmem>>, vector<16x48xf32>
    tpu.vector_store %arg12[%c0_110, %c0_111], %544 {strides = array<i32>} : memref<16x48xf32, #tpu.memory_space<vmem>>, vector<16x48xf32>,
    return
  }
}

</mosaic_0001>

<bundles_post_ra>
// kernel: tpu_custom_call.1
= control target key start
LH: loop header
LB: loop body
LE: loop exit
PB: predicated region body
PF: predicated region fallthrough
CT: control target
= control target key end

     0   :  { %20 = vsyncpa [#allocation3], 0  ;;  %s3533_s0 = inlined_call_operand.hbm [shape: f32[16,21], index: 0, kind: input, shape index: {}]   ;;  %s3534_s1 = inlined_call_operand.vmem [shape: f32[2,16], index: 1, kind: input, shape index: {}]   ;;  %s3535_s2 = inlined_call_operand.hbm [shape: f32[16,128], index: 2, kind: input, shape index: {}]   ;;  %s3536_s3 = inlined_call_operand.vmem [shape: f32[1,128], index: 3, kind: input, shape index: {}]   ;;  %s3537_s4 = inlined_call_operand.hbm [shape: bf16[21,128], index: 4, kind: input, shape index: {}]   ;;  %s3538_s5 = inlined_call_operand.hbm [shape: bf16[32,128], index: 5, kind: input, shape index: {}]   ;;  %s3539_s6 = inlined_call_operand.vmem [shape: f32[1,128], index: 6, kind: input, shape index: {}]   ;;  %s3540_s7 = inlined_call_operand.hbm [shape: bf16[32,128], index: 7, kind: input, shape index: {}]   ;;  %s3541_s8 = inlined_call_operand.hbm [shape: bf16[32,128], index: 8, kind: input, shape index: {}]   ;;  %s3542_s9 = inlined_call_operand.vmem [shape: f32[1,128], index: 9, kind: input, shape index: {}]   ;;  %s3543_s10 = inlined_call_operand.vmem [shape: f32[32,48], index: 10, kind: input, shape index: {}]   ;;  %s3544_s11 = inlined_call_operand.vmem [shape: f32[1,48], index: 11, kind: input, shape index: {}]   ;;  %s3545_s12 = inlined_call_operand.hbm [shape: f32[16,48], index: 12, kind: output, shape index: {0}]   ;;  %s3546_s13 = inlined_call_operand.hbm [shape: f32[2,2,32], index: 13, kind: output, shape index: {1}]   ;;  %s3547_s14 = inlined_call_operand.hbm [shape: f32[2,2,32], index: 14, kind: output, shape index: {2}]  }
   0x1   :  { %21 = vsyncpa [#allocation6], 0 }
   0x2   :  { %22 = vsyncpa [#allocation9], 0 }
   0x3   :  { %23 = vsyncpa [#allocation12], 0 }
   0x4   :  { %24 = vsyncpa [#allocation4], 0 }
   0x5   :  { %25 = vsyncpa [#allocation15], 0  ;;  %s2867_s29 = smov [#allocation5]   ;;  %s2657_s17 = scalar_lea.hbm %s3535_s2, 256 }
   0x6   :  { %s45_s30 = sshll.u32 %s2867_s29, 4  ;;  %p2658_p0 = scmp.ne.s32.totalorder %s3535_s2, %s2657_s17  ;;  %s46_s30 = int_to_ptr.vmem [resolvable:$true] %s45_s30 }
   0x7   :  { %p2661_p1 = scmp.lt.u32.totalorder %s2657_s17, %s3535_s2 }
   0x9   :  { %p2663_p2 = pnand %p2661_p1, %p2658_p0 }
   0xb   :  { %2666 = shalt.err (!%p2663_p2)
}
   0xc   :  { %s2667_s22 = scalar_lea.vmem %s46_s30, 256  ;;  %p2672_p4 = scmp.lt.s32.totalorder %s46_s30, %s46_s30 }
   0xd   :  { %p2668_p3 = scmp.ne.s32.totalorder %s46_s30, %s2667_s22  ;;  %p2673_p5 = scmp.lt.s32.totalorder %s2667_s22, %s2667_s22 }
   0xf   :  { %p2674_p6 = por %p2673_p5, %p2672_p4 }
  0x11   :  { %p2675_p7 = pnand %p2674_p6, %p2668_p3 }
  0x13   :  { %2678 = shalt.err (!%p2675_p7)
}
  0x14   :  { %s2868_s23 = smov 128   ;;  %s2869_s24 = smov 8  }
  0x15   :  { %51 = dma.hbm_to_vmem [thread:$0]  %s3535_s2, 256, %s46_s30, [#allocation6], %s2868_s23, %s2868_s23, %s2869_s24  }
  0x16   :  { %s2870_s27 = smov [#allocation8]   ;;  %s2871_s29 = smov [#allocation2]  }
  0x17   :  { %s71_s28 = sshll.u32 %s2870_s27, 4  ;;  %s31_s15 = sshll.u32 %s2871_s29, 4  ;;  %s72_s28 = int_to_ptr.vmem [resolvable:$true] %s71_s28  ;;  %s32_s15 = int_to_ptr.vmem [resolvable:$true] %s31_s15 }
  0x18   :  { %s2679_s18 = scalar_lea.hbm %s3538_s5, 256 }
  0x19   :  { %p2680_p8 = scmp.ne.s32.totalorder %s3538_s5, %s2679_s18  ;;  %p2683_p9 = scmp.lt.u32.totalorder %s2679_s18, %s3538_s5 }
  0x1b   :  { %p2685_p10 = pnand %p2683_p9, %p2680_p8 }
  0x1d   :  { %2688 = shalt.err (!%p2685_p10)
}
  0x1e   :  { %s2689_s2 = scalar_lea.vmem %s72_s28, 256  ;;  %p2694_p12 = scmp.lt.s32.totalorder %s72_s28, %s72_s28 }
  0x1f   :  { %p2690_p11 = scmp.ne.s32.totalorder %s72_s28, %s2689_s2  ;;  %p2695_p13 = scmp.lt.s32.totalorder %s2689_s2, %s2689_s2 }
  0x21   :  { %p2696_p0 = por %p2695_p13, %p2694_p12 }
  0x23   :  { %p2697_p1 = pnand %p2696_p0, %p2690_p11 }
  0x25   :  { %2700 = shalt.err (!%p2697_p1)
}
  0x26   :  { %s2872_s30 = smov 64   ;;  %s2873_s25 = smov 4  }
  0x27   :  { %77 = dma.hbm_to_vmem [thread:$0]  %s3538_s5, 256, %s72_s28, [#allocation9], %s2872_s30, %s2872_s30, %s2873_s25  }
  0x28   :  { %s2701_s17 = scalar_lea.hbm %s3533_s0, 256 }
  0x29   :  { %p2702_p2 = scmp.ne.s32.totalorder %s3533_s0, %s2701_s17  ;;  %p2705_p3 = scmp.lt.u32.totalorder %s2701_s17, %s3533_s0 }
  0x2b   :  { %p2707_p4 = pnand %p2705_p3, %p2702_p2 }
  0x2d   :  { %2710 = shalt.err (!%p2707_p4)
}
  0x2e   :  { %s2711_s22 = scalar_lea.vmem %s32_s15, 256  ;;  %p2716_p6 = scmp.lt.s32.totalorder %s32_s15, %s32_s15 }
  0x2f   :  { %p2712_p5 = scmp.ne.s32.totalorder %s32_s15, %s2711_s22  ;;  %p2717_p7 = scmp.lt.s32.totalorder %s2711_s22, %s2711_s22 }
  0x31   :  { %p2718_p8 = por %p2717_p7, %p2716_p6 }
  0x33   :  { %p2719_p9 = pnand %p2718_p8, %p2712_p5 }
  0x35   :  { %2722 = shalt.err (!%p2719_p9)
}
  0x36   :  { %37 = dma.hbm_to_vmem [thread:$0]  %s3533_s0, 256, %s32_s15, [#allocation3], %s2868_s23, %s2868_s23, %s2869_s24  }
  0x37   :  { %s2874_s2 = smov [#allocation7]   ;;  %s2875_s27 = smov [#allocation10]  }
  0x38   :  { %s59_s26 = sshll.u32 %s2874_s2, 4  ;;  %s85_s29 = sshll.u32 %s2875_s27, 4  ;;  %s60_s26 = int_to_ptr.vmem [resolvable:$true] %s59_s26  ;;  %s86_s29 = int_to_ptr.vmem [resolvable:$true] %s85_s29 }
  0x39   :  { %s2723_s18 = scalar_lea.hbm %s3537_s4, 192 }
  0x3a   :  { %p2724_p10 = scmp.ne.s32.totalorder %s3537_s4, %s2723_s18  ;;  %p2727_p11 = scmp.lt.u32.totalorder %s2723_s18, %s3537_s4 }
  0x3c   :  { %p2729_p12 = pnand %p2727_p11, %p2724_p10 }
  0x3e   :  { %2732 = shalt.err (!%p2729_p12)
}
  0x3f   :  { %s2733_s0 = scalar_lea.vmem %s60_s26, 192  ;;  %p2738_p0 = scmp.lt.s32.totalorder %s60_s26, %s60_s26 }
  0x40   :  { %p2734_p13 = scmp.ne.s32.totalorder %s60_s26, %s2733_s0  ;;  %p2739_p1 = scmp.lt.s32.totalorder %s2733_s0, %s2733_s0 }
  0x42   :  { %p2740_p2 = por %p2739_p1, %p2738_p0 }
  0x44   :  { %p2741_p3 = pnand %p2740_p2, %p2734_p13 }
  0x46   :  { %2744 = shalt.err (!%p2741_p3)
}
  0x47   :  { %65 = dma.hbm_to_vmem [thread:$0]  %s3537_s4, 192, %s60_s26, [#allocation6], %s2872_s30, %s2872_s30, %s2873_s25  }
  0x48   :  { %s2745_s27 = scalar_lea.hbm %s3540_s7, 256 }
  0x49   :  { %p2746_p4 = scmp.ne.s32.totalorder %s3540_s7, %s2745_s27  ;;  %p2749_p5 = scmp.lt.u32.totalorder %s2745_s27, %s3540_s7 }
  0x4b   :  { %p2751_p6 = pnand %p2749_p5, %p2746_p4 }
  0x4d   :  { %2754 = shalt.err (!%p2751_p6)
}
  0x4e   :  { %s2755_s20 = scalar_lea.vmem %s86_s29, 256  ;;  %p2760_p8 = scmp.lt.s32.totalorder %s86_s29, %s86_s29 }
  0x4f   :  { %p2756_p7 = scmp.ne.s32.totalorder %s86_s29, %s2755_s20  ;;  %p2761_p9 = scmp.lt.s32.totalorder %s2755_s20, %s2755_s20 }
  0x51   :  { %p2762_p10 = por %p2761_p9, %p2760_p8 }
  0x53   :  { %p2763_p11 = pnand %p2762_p10, %p2756_p7 }
  0x55   :  { %2766 = shalt.err (!%p2763_p11)
}
  0x56   :  { %91 = dma.hbm_to_vmem [thread:$0]  %s3540_s7, 256, %s86_s29, [#allocation9], %s2872_s30, %s2872_s30, %s2873_s25  }
  0x57   :  { %s2876_s21 = smov [#allocation11]   ;;  %s2767_s5 = scalar_lea.hbm %s3541_s8, 256 }
  0x58   :  { %s97_s22 = sshll.u32 %s2876_s21, 4  ;;  %p2768_p12 = scmp.ne.s32.totalorder %s3541_s8, %s2767_s5  ;;  %s98_s22 = int_to_ptr.vmem [resolvable:$true] %s97_s22 }
  0x59   :  { %p2771_p13 = scmp.lt.u32.totalorder %s2767_s5, %s3541_s8 }
  0x5b   :  { %p2773_p0 = pnand %p2771_p13, %p2768_p12 }
  0x5d   :  { %2776 = shalt.err (!%p2773_p0)
}
  0x5e   :  { %s2777_s17 = scalar_lea.vmem %s98_s22, 256  ;;  %p2782_p2 = scmp.lt.s32.totalorder %s98_s22, %s98_s22 }
  0x5f   :  { %p2778_p1 = scmp.ne.s32.totalorder %s98_s22, %s2777_s17  ;;  %p2783_p3 = scmp.lt.s32.totalorder %s2777_s17, %s2777_s17 }
  0x61   :  { %p2784_p4 = por %p2783_p3, %p2782_p2 }
  0x63   :  { %p2785_p5 = pnand %p2784_p4, %p2778_p1 }
  0x65   :  { %2788 = shalt.err (!%p2785_p5)
}
  0x66   :  { %103 = dma.hbm_to_vmem [thread:$0]  %s3541_s8, 256, %s98_s22, [#allocation12], %s2872_s30, %s2872_s30, %s2873_s25  }
  0x67   :  { %2855 = dma.done.wait [#allocation3], 256  }
  0x68   :  { %2856 = vsyncadd [#allocation3], 4294967040 }
  0x69   :  { %2857 = dma.done.wait [#allocation6], 448  }
  0x6a   :  { %2858 = vsyncadd [#allocation6], 4294966848 }
  0x6b   :  { %2859 = dma.done.wait [#allocation9], 512  }
  0x6c   :  { %2860 = vsyncadd [#allocation9], 4294966784 }
  0x6d   :  { %2861 = dma.done.wait [#allocation12], 256  }
  0x6e   :  { %2862 = vsyncadd [#allocation12], 4294967040  ;;  %v2877_v0 = vmov 0.0|0.0   ;;  %vm2878_vm0 = vmmov 0   ;;  %v2879_v1 = vmov 0.0   ;;  %v130_v2 = vld [vmem:[#allocation5] sm:$0xff] }
  0x6f   :  { %2465 = vmatprep.subr.bf16.mxu0 %v2877_v0  ;;  %2251 = vmatprep.mubr.msk.f32.mxu0 %vm2878_vm0, %v2879_v1  ;;  %v131_v3 = vld [vmem:[#allocation5 + $0x8] sm:$0xff]  ;;  %vm139_vm1 = vcmask 130048   ;;  %v129_v5 = vld [vmem:[%s3534_s1] sm:$0x3]  ;;  %vm253_vm2 = vcmask 1041408   ;;  %vm254_vm3 = vcmask 1042432  }
  0x70   :  { %2254 = vmatprep.subr.bf16.mxu1 %v2879_v1  ;;  %2258 = vmatprep.mubr.msk.bf16.mxu1 %vm2878_vm0, %v2879_v1  ;;  %v2466_v4 = vpack.c.bf16 %v131_v3, %v130_v2  ;;  %v2496_v6 = vld [vmem:[#allocation7] sm:$0xff]   ;;  %v2497_v7 = vld [vmem:[#allocation7 + $0x8] ss:$0 sps:$4 sm:$0x77]   ;;  %v2880_v8 = vmov 65535   ;;  %v3064_v10 = vld [vmem:[#allocation8] sm:$0xff]  }
  0x71   :  { %2255 = vmatpush3.bf16.msra.mxu1 %v2496_v6  ;;  %v255_v9 = vsel %vm253_vm2, 4294967295, %v2880_v8  ;;  %v227_v11 = vld [vmem:[#allocation2] sm:$0xff]  ;;  %v228_v12 = vld [vmem:[#allocation2 + $0x8] sm:$0xff]  ;;  %v3068_v15 = vld [vmem:[#allocation8 + $0x8] sm:$0xff]   ;;  %vm249_vm4 = vcmask 171008   ;;  %vm314_vm5 = vcmask 261120  }
  0x72   :  { %2467 = vmatpush3.bf16.msra.mxu0 %v2466_v4  ;;  %2256 = vmatprep.subr.bf16.mxu1 %v2879_v1  ;;  %v256_v13 = vsel %vm254_vm3, %v255_v9, 0  ;;  %v229_v16 = vpack.c.bf16 %v228_v12, %v227_v11  ;;  %v2107_v17 = vld [vmem:[%s3536_s3] ss:$0 sm:$0xff]  ;;  %v3093_v31 = vld [vmem:[#allocation11] sm:$0xff]   ;;  %v3098_v36 = vld [vmem:[#allocation11 + $0x8] sm:$0xff]   ;;  %s2881_s3 = smov 96  }
  0x73   :  { %2262 = vmatprep.subr.bf16.mxu0 %v2879_v1  ;;  %v258_v14 = vand.u32 %v2497_v7, %v256_v13  ;;  %v2109_v23 = vld [vmem:[%s3539_s6] ss:$0 sm:$0xff]  ;;  %s2882_s6 = smov 32   ;;  %v3120_v50 = vld [vmem:[#allocation10 + $0x8] sm:$0xff]   ;;  %vm1913_vm6 = vcmask 1043456   ;;  %vm1915_vm7 = vcmask 1045504  }
  0x74   :  { %v3117_v49 = vld [vmem:[#allocation10] sm:$0xff]   ;;  %vm2016_vm8 = vcmask 64512   ;;  %vm1875_vm9 = vcmask 261126   ;;  %vm1882_vm10 = vcmask 254976   ;;  %s2884_s7 = smov [#allocation16]  }
  0x75   :  { %2252 = vmatmul.mubr.msk.f32.vlgmr.msra.gmra.mrb[0].mxu0 %vm139_vm1, %v129_v5  ;;  %2257 = vmatpush3.bf16.msra.mxu1 %v258_v14  ;;  %v3144_v60 = vld [vmem:[%s3542_s9] ss:$0 sm:$0xff]  ;;  %s2085_s29 = sshll.u32 %s2884_s7, 4  ;;  %s3473_s29 = int_to_ptr.vmem [resolvable:$true] %s2085_s29 }
  0x76   :  { %2266 = vmatprep.mubr.msk.bf16.mxu0 %vm2878_vm0, %v2879_v1  ;;  %2263 = vmatpush3.bf16.msra.mxu0 %v3064_v10 }
  0x77   :  { %2264 = vmatprep.subr.bf16.mxu0 %v2879_v1  ;;  %2270 = vmatprep.subr.bf16.mxu1 %v2879_v1 }
  0x78   :  { %2259 = vmatmul.mubr.msk.bf16.vlgmr.msra.gmra.mrb[0].mxu1 %vm249_vm4, %v229_v16 }
  0x79   :  { %2274 = vmatprep.mubr.msk.bf16.mxu1 %vm2878_vm0, %v2879_v1  ;;  %2271 = vmatpush3.bf16.msra.mxu1 %v3093_v31 }
  0x7a   :  { %2265 = vmatpush3.bf16.msra.mxu0 %v3068_v15  ;;  %2272 = vmatprep.subr.bf16.mxu1 %v2879_v1 }
  0x7b   :  { %2278 = vmatprep.subr.bf16.mxu0 %v2879_v1 }
  0x7d   :  { %2273 = vmatpush3.bf16.msra.mxu1 %v3098_v36 }
  0x7e   :  { %2286 = vmatprep.subr.bf16.mxu1 %v2879_v1 }
 0x148   :  { %v209_v18 = vpop.f32.mrb[0].mxu0 }
 0x149   :  { %v210_v19 = vadd.f32 %v2107_v17, %v209_v18  ;;  %v2253_v20 = vpop.f32.mrb[1].mxu0 }
 0x14b   :  { %2504 = vtanh.f32 %v210_v19  ;;  %v294_v24 = vpop.f32.mrb[0].mxu1 }
 0x14c   :  { %v2260_v25 = vpop.f32.mrb[1].mxu1  ;;  %v3091_v29 = vadd.f32 %v2109_v23, %v294_v24 }
 0x14d   :  { %v297_v26 = vpop.f32.mrb[2].mxu1 }
 0x14e   :  { %v3089_v27 = vadd.f32 %v2109_v23, %v297_v26  ;;  %v2261_v28 = vpop.f32.mrb[3].mxu1 }
 0x155   :  { %v3079_v21 = vpop.eup %2504 }
 0x156   :  { %v301_v22 = vpack.c.bf16 %v3079_v21, %v3079_v21 }
 0x158   :  { %2267 = vmatmul.mubr.msk.bf16.vlgmr.msra.gmra.mrb[4].mxu0 %vm314_vm5, %v301_v22 }
 0x159   :  { %2282 = vmatprep.mubr.msk.bf16.mxu0 %vm2878_vm0, %v2879_v1  ;;  %2279 = vmatpush3.bf16.msra.mxu0 %v3117_v49 }
 0x15a   :  { %2280 = vmatprep.subr.bf16.mxu0 %v2879_v1 }
 0x15d   :  { %2281 = vmatpush3.bf16.msra.mxu0 %v3120_v50 }
 0x15e   :  { %2294 = vmatprep.subr.bf16.mxu0 %v2879_v1 }
 0x22b   :  { %v352_v30 = vpop.f32.mrb[4].mxu0 }
 0x22c   :  { %v358_v32 = vadd.f32 %v352_v30, %v3091_v29  ;;  %v2268_v33 = vpop.f32.mrb[5].mxu0 }
 0x22d   :  { %v355_v34 = vpop.f32.mrb[6].mxu0 }
 0x22e   :  { %v2269_v35 = vpop.f32.mrb[7].mxu0  ;;  %2506 = vtanh.f32 %v358_v32  ;;  %v2116_v38 = vmul.f32 -1.442695, %v358_v32 }
 0x230   :  { %2508 = vpow2.f32 %v2116_v38 }
 0x238   :  { %v2507_v37 = vpop.eup %2506 }
 0x239   :  { %372 = vrot.lane.b32.xlu0 %v2507_v37, %s2872_s30 }
 0x23a   :  { %v2509_v39 = vpop.eup %2508 }
 0x23b   :  { %v362_v40 = vadd.f32 1.0, %v2509_v39 }
 0x23d   :  { %367 = vrot.lane.b32.xlu0 %v3079_v21, %s2881_s3  ;;  %2510 = vrcp.f32 %v362_v40 }
 0x241   :  { %389 = vrot.lane.b32.xlu0 %v301_v22, %s2881_s3 }
 0x247   :  { %v2511_v41 = vpop.eup %2510 }
 0x2ab   :  { %v373_v42 = vpop.permute.xlu0 %372 }
 0x2ac   :  { %v375_v43 = vmul.f32 %v2511_v41, %v373_v42 }
 0x2ae   :  { %377 = vrot.lane.b32.xlu1 %v375_v43, %s2882_s6 }
 0x2af   :  { %v368_v44 = vpop.permute.xlu0 %367 }
 0x2b0   :  { %v370_v46 = vmul.f32 %v2511_v41, %v368_v44 }
 0x2b3   :  { %v390_v45 = vpop.permute.xlu0 %389 }
 0x2b4   :  { %2275 = vmatmul.mubr.msk.bf16.vlgmr.msra.gmra.mrb[4].mxu1 %vm314_vm5, %v390_v45 }
 0x2b5   :  { %2287 = vmatpush3.bf16.msra.mxu1 %v3064_v10  ;;  %2290 = vmatprep.mubr.msk.bf16.mxu1 %vm2878_vm0, %v2879_v1 }
 0x2b6   :  { %2288 = vmatprep.subr.bf16.mxu1 %v2879_v1 }
 0x2b9   :  { %2289 = vmatpush3.bf16.msra.mxu1 %v3068_v15 }
 0x2ba   :  { %2302 = vmatprep.subr.bf16.mxu1 %v2879_v1 }
 0x320   :  { %v378_v47 = vpop.permute.xlu1 %377 }
 0x321   :  { %v3114_v48 = vadd.f32 %v378_v47, %v370_v46 }
 0x323   :  { %2512 = vtanh.f32 %v3114_v48  ;;  %v590_v28 = vrot.slane %v3114_v48, 6 }
 0x32d   :  { %v2513_v51 = vpop.eup %2512 }
 0x32e   :  { %383 = vrot.lane.b32.xlu1 %v2513_v51, %s2872_s30 }
 0x387   :  { %v440_v52 = vpop.f32.mrb[4].mxu1 }
 0x388   :  { %v2276_v53 = vpop.f32.mrb[5].mxu1 }
 0x389   :  { %v443_v54 = vpop.f32.mrb[6].mxu1 }
 0x38a   :  { %v2277_v55 = vpop.f32.mrb[7].mxu1 }
 0x3a0   :  { %v384_v56 = vpop.permute.xlu1 %383 }
 0x3a1   :  { %v386_v57 = vmul.f32 %v2511_v41, %v384_v56 }
 0x3a3   :  { %v387_v58 = vpack.c.bf16 %v386_v57, %v386_v57 }
 0x3a5   :  { %447 = vrot.lane.b32.xlu1 %v387_v58, %s2882_s6 }
 0x417   :  { %v448_v59 = vpop.permute.xlu1 %447 }
 0x418   :  { %2283 = vmatmul.mubr.msk.bf16.vlgmr.msra.gmra.mrb[8].mxu0 %vm314_vm5, %v448_v59  ;;  %2291 = vmatmul.mubr.msk.bf16.vlgmr.msra.gmra.mrb[8].mxu1 %vm314_vm5, %v448_v59 }
 0x419   :  { %2295 = vmatpush3.bf16.msra.mxu0 %v3093_v31  ;;  %2303 = vmatpush3.bf16.msra.mxu1 %v3117_v49 }
 0x41a   :  { %2296 = vmatprep.subr.bf16.mxu0 %v2879_v1  ;;  %2304 = vmatprep.subr.bf16.mxu1 %v2879_v1 }
 0x41b   :  { %2298 = vmatprep.mubr.msk.bf16.mxu0 %vm2878_vm0, %v2879_v1  ;;  %2306 = vmatprep.mubr.msk.bf16.mxu1 %vm2878_vm0, %v2879_v1 }
 0x41d   :  { %2297 = vmatpush3.bf16.msra.mxu0 %v3098_v36  ;;  %2305 = vmatpush3.bf16.msra.mxu1 %v3120_v50 }
 0x41e   :  { %2310 = vmatprep.subr.bf16.mxu0 %v2879_v1  ;;  %2318 = vmatprep.subr.bf16.mxu1 %v2879_v1 }
 0x4eb   :  { %v498_v61 = vpop.f32.mrb[8].mxu0  ;;  %v572_v62 = vpop.f32.mrb[8].mxu1 }
 0x4ec   :  { %v499_v63 = vadd.f32 %v498_v61, %v440_v52  ;;  %v579_v0 = vrot.slane %v572_v62, 6  ;;  %v2284_v2 = vpop.f32.mrb[9].mxu0  ;;  %v2292_v3 = vpop.f32.mrb[9].mxu1 }
 0x4ed   :  { %v501_v4 = vpop.f32.mrb[10].mxu0  ;;  %v575_v5 = vpop.f32.mrb[10].mxu1 }
 0x4ee   :  { %v510_v6 = vadd.f32 %v3144_v60, %v499_v63  ;;  %v581_v7 = vadd.f32 %v579_v0, %v3091_v29  ;;  %v2285_v8 = vpop.f32.mrb[11].mxu0  ;;  %v2293_v9 = vpop.f32.mrb[11].mxu1 }
 0x4f0   :  { %2514 = vtanh.f32 %v510_v6  ;;  %v2124_v13 = vmul.f32 -1.442695, %v510_v6  ;;  %v2126_v14 = vmul.f32 -1.442695, %v581_v7 }
 0x4f1   :  { %2516 = vtanh.f32 %v581_v7 }
 0x4f2   :  { %2518 = vpow2.f32 %v2124_v13 }
 0x4f3   :  { %2520 = vpow2.f32 %v2126_v14 }
 0x4fa   :  { %v2515_v11 = vpop.eup %2514 }
 0x4fb   :  { %v2517_v12 = vpop.eup %2516  ;;  %523 = vrot.lane.b32.xlu0 %v2515_v11, %s2872_s30 }
 0x4fc   :  { %594 = vrot.lane.b32.xlu1 %v2517_v12, %s2872_s30  ;;  %v2519_v16 = vpop.eup %2518 }
 0x4fd   :  { %v2521_v17 = vpop.eup %2520  ;;  %v514_v18 = vadd.f32 1.0, %v2519_v16 }
 0x4fe   :  { %v585_v19 = vadd.f32 1.0, %v2521_v17 }
 0x4ff   :  { %518 = vrot.lane.b32.xlu0 %v3079_v21, %s2872_s30  ;;  %2522 = vrcp.f32 %v514_v18 }
 0x500   :  { %2524 = vrcp.f32 %v585_v19 }
 0x509   :  { %v2523_v20 = vpop.eup %2522 }
 0x50a   :  { %v2525_v23 = vpop.eup %2524 }
 0x50b   :  { %v592_v32 = vmul.f32 %v2525_v23, %v590_v28 }
 0x56d   :  { %v524_v22 = vpop.permute.xlu0 %523 }
 0x56e   :  { %v595_v24 = vpop.permute.xlu1 %594  ;;  %v526_v25 = vmul.f32 %v2523_v20, %v524_v22 }
 0x56f   :  { %v597_v26 = vmul.f32 %v2525_v23, %v595_v24 }
 0x570   :  { %528 = vrot.lane.b32.xlu1 %v526_v25, %s2882_s6 }
 0x571   :  { %599 = vrot.lane.b32.xlu0 %v597_v26, %s2882_s6  ;;  %v519_v21 = vpop.permute.xlu0 %518 }
 0x572   :  { %v521_v30 = vmul.f32 %v2523_v20, %v519_v21 }
 0x5e2   :  { %v529_v33 = vpop.permute.xlu1 %528 }
 0x5e3   :  { %v600_v34 = vpop.permute.xlu0 %599  ;;  %v3155_v35 = vadd.f32 %v529_v33, %v521_v30 }
 0x5e4   :  { %v3157_v37 = vadd.f32 %v600_v34, %v592_v32 }
 0x5e5   :  { %2526 = vtanh.f32 %v3155_v35 }
 0x5e6   :  { %2528 = vtanh.f32 %v3157_v37  ;;  %v781_v25 = vrot.slane %v3157_v37, 6 }
 0x5ef   :  { %v2527_v38 = vpop.eup %2526 }
 0x5f0   :  { %v2529_v39 = vpop.eup %2528  ;;  %534 = vrot.lane.b32.xlu1 %v2527_v38, %s2872_s30 }
 0x5f1   :  { %605 = vrot.lane.b32.xlu0 %v2529_v39, %s2872_s30 }
 0x662   :  { %v535_v40 = vpop.permute.xlu1 %534 }
 0x663   :  { %v606_v41 = vpop.permute.xlu0 %605  ;;  %v3163_v42 = vmul.f32 %v2523_v20, %v535_v40 }
 0x664   :  { %v608_v43 = vmul.f32 %v2525_v23, %v606_v41 }
 0x665   :  { %v610_v44 = vpack.c.bf16 %v3163_v42, %v3163_v42 }
 0x666   :  { %v609_v45 = vpack.c.bf16 %v608_v43, %v608_v43 }
 0x667   :  { %612 = vrot.lane.b32.xlu1 %v610_v44, %s2882_s6 }
 0x668   :  { %v658_v46 = vrot.slane %v609_v45, 1 }
 0x66a   :  { %659 = vrot.lane.b32.xlu0 %v658_v46, %s2882_s6 }
 0x6d9   :  { %v613_v47 = vpop.permute.xlu1 %612 }
 0x6da   :  { %2299 = vmatmul.mubr.msk.bf16.vlgmr.msra.gmra.mrb[12].mxu0 %vm314_vm5, %v613_v47 }
 0x6db   :  { %2311 = vmatpush3.bf16.msra.mxu0 %v3064_v10  ;;  %2314 = vmatprep.mubr.msk.bf16.mxu0 %vm2878_vm0, %v2879_v1 }
 0x6dc   :  { %v660_v48 = vpop.permute.xlu0 %659  ;;  %2312 = vmatprep.subr.bf16.mxu0 %v2879_v1 }
 0x6dd   :  { %2307 = vmatmul.mubr.msk.bf16.vlgmr.msra.gmra.mrb[12].mxu1 %vm314_vm5, %v660_v48 }
 0x6de   :  { %2319 = vmatpush3.bf16.msra.mxu1 %v3093_v31  ;;  %2322 = vmatprep.mubr.msk.bf16.mxu1 %vm2878_vm0, %v2879_v1 }
 0x6df   :  { %2313 = vmatpush3.bf16.msra.mxu0 %v3068_v15  ;;  %2320 = vmatprep.subr.bf16.mxu1 %v2879_v1 }
 0x6e0   :  { %2326 = vmatprep.subr.bf16.mxu0 %v2879_v1 }
 0x6e2   :  { %2315 = vmatmul.mubr.msk.bf16.vlgmr.msra.gmra.mrb[16].mxu0 %vm314_vm5, %v660_v48  ;;  %2321 = vmatpush3.bf16.msra.mxu1 %v3098_v36 }
 0x6e3   :  { %2334 = vmatprep.subr.bf16.mxu1 %v2879_v1  ;;  %2327 = vmatpush3.bf16.msra.mxu0 %v3117_v49 }
 0x6e4   :  { %2328 = vmatprep.subr.bf16.mxu0 %v2879_v1  ;;  %2330 = vmatprep.mubr.msk.bf16.mxu0 %vm2878_vm0, %v2879_v1 }
 0x6e7   :  { %2329 = vmatpush3.bf16.msra.mxu0 %v3120_v50 }
 0x6e8   :  { %2342 = vmatprep.subr.bf16.mxu0 %v2879_v1 }
 0x7ad   :  { %v651_v51 = vpop.f32.mrb[12].mxu0 }
 0x7ae   :  { %v2300_v52 = vpop.f32.mrb[13].mxu0 }
 0x7af   :  { %v654_v53 = vpop.f32.mrb[14].mxu0 }
 0x7b0   :  { %v698_v54 = vpop.f32.mrb[12].mxu1  ;;  %v2301_v55 = vpop.f32.mrb[15].mxu0 }
 0x7b1   :  { %v699_v56 = vadd.f32 %v698_v54, %v651_v51  ;;  %v2308_v57 = vpop.f32.mrb[13].mxu1 }
 0x7b2   :  { %v701_v58 = vpop.f32.mrb[14].mxu1 }
 0x7b3   :  { %v704_v59 = vadd.f32 %v3144_v60, %v699_v56  ;;  %v2309_v61 = vpop.f32.mrb[15].mxu1 }
 0x7b5   :  { %2530 = vtanh.f32 %v704_v59  ;;  %v763_v62 = vpop.f32.mrb[16].mxu0  ;;  %v2129_v7 = vmul.f32 -1.442695, %v704_v59 }
 0x7b6   :  { %v770_v63 = vrot.slane %v763_v62, 4  ;;  %v2316_v0 = vpop.f32.mrb[17].mxu0 }
 0x7b7   :  { %v766_v2 = vpop.f32.mrb[18].mxu0 }
 0x7b8   :  { %v772_v3 = vadd.f32 %v770_v63, %v3091_v29  ;;  %v2317_v4 = vpop.f32.mrb[19].mxu0 }
 0x7ba   :  { %2532 = vtanh.f32 %v772_v3  ;;  %v2131_v8 = vmul.f32 -1.442695, %v772_v3 }
 0x7bb   :  { %2534 = vpow2.f32 %v2129_v7 }
 0x7bc   :  { %2536 = vpow2.f32 %v2131_v8 }
 0x7bf   :  { %v2531_v5 = vpop.eup %2530 }
 0x7c0   :  { %714 = vrot.lane.b32.xlu1 %v2531_v5, %s2872_s30 }
 0x7c4   :  { %v2533_v6 = vpop.eup %2532 }
 0x7c5   :  { %785 = vrot.lane.b32.xlu0 %v2533_v6, %s2872_s30  ;;  %v2535_v9 = vpop.eup %2534 }
 0x7c6   :  { %v708_v11 = vadd.f32 1.0, %v2535_v9  ;;  %v2537_v12 = vpop.eup %2536 }
 0x7c7   :  { %v776_v13 = vadd.f32 1.0, %v2537_v12 }
 0x7c8   :  { %2538 = vrcp.f32 %v708_v11 }
 0x7c9   :  { %2540 = vrcp.f32 %v776_v13 }
 0x7d2   :  { %v2539_v14 = vpop.eup %2538 }
 0x7d3   :  { %v2541_v18 = vpop.eup %2540  ;;  %v712_v22 = vmul.f32 %v2539_v14, %v3155_v35 }
 0x7d4   :  { %v783_v26 = vmul.f32 %v2541_v18, %v781_v25 }
 0x832   :  { %v715_v16 = vpop.permute.xlu1 %714 }
 0x833   :  { %v717_v17 = vmul.f32 %v2539_v14, %v715_v16 }
 0x835   :  { %719 = vrot.lane.b32.xlu1 %v717_v17, %s2882_s6 }
 0x837   :  { %v786_v19 = vpop.permute.xlu0 %785 }
 0x838   :  { %v788_v20 = vmul.f32 %v2541_v18, %v786_v19 }
 0x83a   :  { %790 = vrot.lane.b32.xlu0 %v788_v20, %s2882_s6 }
 0x8a7   :  { %v720_v23 = vpop.permute.xlu1 %719 }
 0x8a8   :  { %v3197_v24 = vadd.f32 %v720_v23, %v712_v22 }
 0x8aa   :  { %2542 = vtanh.f32 %v3197_v24 }
 0x8ac   :  { %v791_v21 = vpop.permute.xlu0 %790 }
 0x8ad   :  { %v3201_v28 = vadd.f32 %v791_v21, %v783_v26 }
 0x8af   :  { %2544 = vtanh.f32 %v3201_v28 }
 0x8b4   :  { %v2543_v30 = vpop.eup %2542 }
 0x8b5   :  { %725 = vrot.lane.b32.xlu1 %v2543_v30, %s2872_s30 }
 0x8b9   :  { %v2545_v32 = vpop.eup %2544 }
 0x8ba   :  { %796 = vrot.lane.b32.xlu0 %v2545_v32, %s2872_s30 }
 0x927   :  { %v726_v33 = vpop.permute.xlu1 %725 }
 0x928   :  { %v3206_v34 = vmul.f32 %v2539_v14, %v726_v33  ;;  %v972_v14 = vrot.slane %v3201_v28, 6 }
 0x92a   :  { %v801_v35 = vpack.c.bf16 %v3206_v34, %v3206_v34  ;;  %v1896_v26 = vrot.slane %v3206_v34, 6 }
 0x92c   :  { %803 = vrot.lane.b32.xlu1 %v801_v35, %s2882_s6  ;;  %v797_v37 = vpop.permute.xlu0 %796 }
 0x92d   :  { %v799_v38 = vmul.f32 %v2541_v18, %v797_v37  ;;  %v1912_v37 = vsel %vm253_vm2, %v3163_v42, %v1896_v26 }
 0x92f   :  { %v800_v39 = vpack.c.bf16 %v799_v38, %v799_v38 }
 0x931   :  { %v849_v40 = vrot.slane %v800_v39, 2 }
 0x933   :  { %850 = vrot.lane.b32.xlu0 %v849_v40, %s2882_s6 }
 0x99e   :  { %v804_v41 = vpop.permute.xlu1 %803 }
 0x99f   :  { %2323 = vmatmul.mubr.msk.bf16.vlgmr.msra.gmra.mrb[16].mxu1 %vm314_vm5, %v804_v41 }
 0x9a0   :  { %2335 = vmatpush3.bf16.msra.mxu1 %v3064_v10  ;;  %2338 = vmatprep.mubr.msk.bf16.mxu1 %vm2878_vm0, %v2879_v1 }
 0x9a1   :  { %2336 = vmatprep.subr.bf16.mxu1 %v2879_v1 }
 0x9a4   :  { %2337 = vmatpush3.bf16.msra.mxu1 %v3068_v15 }
 0x9a5   :  { %v851_v43 = vpop.permute.xlu0 %850  ;;  %2350 = vmatprep.subr.bf16.mxu1 %v2879_v1 }
 0x9a6   :  { %2331 = vmatmul.mubr.msk.bf16.vlgmr.msra.gmra.mrb[20].mxu0 %vm314_vm5, %v851_v43 }
 0x9a7   :  { %2339 = vmatmul.mubr.msk.bf16.vlgmr.msra.gmra.mrb[20].mxu1 %vm314_vm5, %v851_v43  ;;  %2343 = vmatpush3.bf16.msra.mxu0 %v3093_v31 }
 0x9a8   :  { %2351 = vmatpush3.bf16.msra.mxu1 %v3117_v49  ;;  %2344 = vmatprep.subr.bf16.mxu0 %v2879_v1 }
 0x9a9   :  { %2352 = vmatprep.subr.bf16.mxu1 %v2879_v1  ;;  %2346 = vmatprep.mubr.msk.bf16.mxu0 %vm2878_vm0, %v2879_v1 }
 0x9aa   :  { %2354 = vmatprep.mubr.msk.bf16.mxu1 %vm2878_vm0, %v2879_v1 }
 0x9ab   :  { %2345 = vmatpush3.bf16.msra.mxu0 %v3098_v36 }
 0x9ac   :  { %2353 = vmatpush3.bf16.msra.mxu1 %v3120_v50  ;;  %2358 = vmatprep.subr.bf16.mxu0 %v2879_v1 }
 0x9ad   :  { %2366 = vmatprep.subr.bf16.mxu1 %v2879_v1 }
 0xa72   :  { %v842_v44 = vpop.f32.mrb[16].mxu1 }
 0xa73   :  { %v2324_v45 = vpop.f32.mrb[17].mxu1 }
 0xa74   :  { %v845_v46 = vpop.f32.mrb[18].mxu1 }
 0xa75   :  { %v2325_v47 = vpop.f32.mrb[19].mxu1 }
 0xa79   :  { %v889_v48 = vpop.f32.mrb[20].mxu0 }
 0xa7a   :  { %v890_v51 = vadd.f32 %v889_v48, %v842_v44  ;;  %v954_v52 = vpop.f32.mrb[20].mxu1  ;;  %v2332_v53 = vpop.f32.mrb[21].mxu0 }
 0xa7b   :  { %v961_v54 = vrot.slane %v954_v52, 2  ;;  %v2340_v55 = vpop.f32.mrb[21].mxu1  ;;  %v892_v56 = vpop.f32.mrb[22].mxu0 }
 0xa7c   :  { %v895_v57 = vadd.f32 %v3144_v60, %v890_v51  ;;  %v957_v58 = vpop.f32.mrb[22].mxu1  ;;  %v2333_v59 = vpop.f32.mrb[23].mxu0 }
 0xa7d   :  { %v963_v61 = vadd.f32 %v961_v54, %v3091_v29  ;;  %v2341_v62 = vpop.f32.mrb[23].mxu1 }
 0xa7e   :  { %2546 = vtanh.f32 %v895_v57  ;;  %v2134_v2 = vmul.f32 -1.442695, %v895_v57 }
 0xa7f   :  { %2548 = vtanh.f32 %v963_v61  ;;  %v2136_v3 = vmul.f32 -1.442695, %v963_v61 }
 0xa80   :  { %2550 = vpow2.f32 %v2134_v2 }
 0xa81   :  { %2552 = vpow2.f32 %v2136_v3 }
 0xa88   :  { %v2547_v63 = vpop.eup %2546 }
 0xa89   :  { %v2549_v0 = vpop.eup %2548  ;;  %905 = vrot.lane.b32.xlu0 %v2547_v63, %s2872_s30 }
 0xa8a   :  { %976 = vrot.lane.b32.xlu1 %v2549_v0, %s2872_s30  ;;  %v2551_v4 = vpop.eup %2550 }
 0xa8b   :  { %v2553_v5 = vpop.eup %2552  ;;  %v899_v6 = vadd.f32 1.0, %v2551_v4 }
 0xa8c   :  { %v967_v7 = vadd.f32 1.0, %v2553_v5 }
 0xa8d   :  { %2554 = vrcp.f32 %v899_v6 }
 0xa8e   :  { %2556 = vrcp.f32 %v967_v7 }
 0xa97   :  { %v2555_v29 = vpop.eup %2554 }
 0xa98   :  { %v2557_v9 = vpop.eup %2556  ;;  %v903_v16 = vmul.f32 %v2555_v29, %v3197_v24 }
 0xa99   :  { %v974_v17 = vmul.f32 %v2557_v9, %v972_v14 }
 0xafb   :  { %v906_v8 = vpop.permute.xlu0 %905 }
 0xafc   :  { %v977_v11 = vpop.permute.xlu1 %976  ;;  %v908_v12 = vmul.f32 %v2555_v29, %v906_v8 }
 0xafd   :  { %v979_v13 = vmul.f32 %v2557_v9, %v977_v11 }
 0xafe   :  { %910 = vrot.lane.b32.xlu0 %v908_v12, %s2882_s6 }
 0xaff   :  { %981 = vrot.lane.b32.xlu1 %v979_v13, %s2882_s6 }
 0xb70   :  { %v911_v18 = vpop.permute.xlu0 %910 }
 0xb71   :  { %v982_v19 = vpop.permute.xlu1 %981  ;;  %v3241_v20 = vadd.f32 %v911_v18, %v903_v16 }
 0xb72   :  { %v3243_v22 = vadd.f32 %v982_v19, %v974_v17 }
 0xb73   :  { %2558 = vtanh.f32 %v3241_v20 }
 0xb74   :  { %2560 = vtanh.f32 %v3243_v22  ;;  %v1160_v11 = vrot.slane %v3243_v22, 6 }
 0xb7d   :  { %v2559_v23 = vpop.eup %2558 }
 0xb7e   :  { %v2561_v25 = vpop.eup %2560  ;;  %916 = vrot.lane.b32.xlu0 %v2559_v23, %s2872_s30 }
 0xb7f   :  { %987 = vrot.lane.b32.xlu1 %v2561_v25, %s2872_s30 }
 0xbf0   :  { %v917_v24 = vpop.permute.xlu0 %916 }
 0xbf1   :  { %v988_v21 = vpop.permute.xlu1 %987  ;;  %v919_v28 = vmul.f32 %v2555_v29, %v917_v24 }
 0xbf2   :  { %v990_v30 = vmul.f32 %v2557_v9, %v988_v21 }
 0xbf3   :  { %v992_v32 = vpack.c.bf16 %v919_v28, %v919_v28  ;;  %v1899_v33 = vrot.slane %v919_v28, 4 }
 0xbf4   :  { %v991_v35 = vpack.c.bf16 %v990_v30, %v990_v30 }
 0xbf5   :  { %994 = vrot.lane.b32.xlu1 %v992_v32, %s2882_s6  ;;  %v3254_v38 = vsel %vm1913_vm6, %v1912_v37, %v1899_v33 }
 0xbf6   :  { %v1040_v39 = vrot.slane %v991_v35, 3 }
 0xbf8   :  { %1041 = vrot.lane.b32.xlu0 %v1040_v39, %s2882_s6 }
 0xc67   :  { %v995_v34 = vpop.permute.xlu1 %994 }
 0xc68   :  { %2347 = vmatmul.mubr.msk.bf16.vlgmr.msra.gmra.mrb[24].mxu0 %vm314_vm5, %v995_v34 }
 0xc69   :  { %2359 = vmatpush3.bf16.msra.mxu0 %v3064_v10  ;;  %2362 = vmatprep.mubr.msk.bf16.mxu0 %vm2878_vm0, %v2879_v1 }
 0xc6a   :  { %v1042_v40 = vpop.permute.xlu0 %1041  ;;  %2360 = vmatprep.subr.bf16.mxu0 %v2879_v1 }
 0xc6b   :  { %2355 = vmatmul.mubr.msk.bf16.vlgmr.msra.gmra.mrb[24].mxu1 %vm314_vm5, %v1042_v40 }
 0xc6c   :  { %2367 = vmatpush3.bf16.msra.mxu1 %v3093_v31  ;;  %2370 = vmatprep.mubr.msk.bf16.mxu1 %vm2878_vm0, %v2879_v1 }
 0xc6d   :  { %2361 = vmatpush3.bf16.msra.mxu0 %v3068_v15  ;;  %2368 = vmatprep.subr.bf16.mxu1 %v2879_v1 }
 0xc6e   :  { %2374 = vmatprep.subr.bf16.mxu0 %v2879_v1 }
 0xc70   :  { %2363 = vmatmul.mubr.msk.bf16.vlgmr.msra.gmra.mrb[28].mxu0 %vm314_vm5, %v1042_v40  ;;  %2369 = vmatpush3.bf16.msra.mxu1 %v3098_v36 }
 0xc71   :  { %2375 = vmatpush3.bf16.msra.mxu0 %v3117_v49  ;;  %2382 = vmatprep.subr.bf16.mxu1 %v2879_v1 }
 0xc72   :  { %2376 = vmatprep.subr.bf16.mxu0 %v2879_v1  ;;  %2378 = vmatprep.mubr.msk.bf16.mxu0 %vm2878_vm0, %v2879_v1 }
 0xc75   :  { %2377 = vmatpush3.bf16.msra.mxu0 %v3120_v50 }
 0xc76   :  { %2390 = vmatprep.subr.bf16.mxu0 %v2879_v1 }
 0xd3b   :  { %v1033_v42 = vpop.f32.mrb[24].mxu0 }
 0xd3c   :  { %v2348_v41 = vpop.f32.mrb[25].mxu0 }
 0xd3d   :  { %v1036_v43 = vpop.f32.mrb[26].mxu0 }
 0xd3e   :  { %v1080_v44 = vpop.f32.mrb[24].mxu1  ;;  %v2349_v45 = vpop.f32.mrb[27].mxu0 }
 0xd3f   :  { %v1081_v46 = vadd.f32 %v1080_v44, %v1033_v42  ;;  %v2356_v47 = vpop.f32.mrb[25].mxu1 }
 0xd40   :  { %v1083_v48 = vpop.f32.mrb[26].mxu1 }
 0xd41   :  { %v1086_v51 = vadd.f32 %v3144_v60, %v1081_v46  ;;  %v2357_v52 = vpop.f32.mrb[27].mxu1 }
 0xd43   :  { %2562 = vtanh.f32 %v1086_v51  ;;  %v1145_v53 = vpop.f32.mrb[28].mxu0  ;;  %v2139_v61 = vmul.f32 -1.442695, %v1086_v51 }
 0xd44   :  { %v1151_v54 = vadd.f32 %v1145_v53, %v3089_v27  ;;  %v2364_v55 = vpop.f32.mrb[29].mxu0 }
 0xd45   :  { %v1148_v56 = vpop.f32.mrb[30].mxu0 }
 0xd46   :  { %2564 = vtanh.f32 %v1151_v54  ;;  %v2365_v57 = vpop.f32.mrb[31].mxu0  ;;  %v2141_v62 = vmul.f32 -1.442695, %v1151_v54 }
 0xd47   :  { %2566 = vpow2.f32 %v2139_v61 }
 0xd48   :  { %2568 = vpow2.f32 %v2141_v62 }
 0xd4d   :  { %v2563_v58 = vpop.eup %2562 }
 0xd4e   :  { %1096 = vrot.lane.b32.xlu1 %v2563_v58, %s2872_s30 }
 0xd50   :  { %v2565_v59 = vpop.eup %2564 }
 0xd51   :  { %1164 = vrot.lane.b32.xlu0 %v2565_v59, %s2872_s30  ;;  %v2567_v63 = vpop.eup %2566 }
 0xd52   :  { %v2569_v0 = vpop.eup %2568  ;;  %v1090_v2 = vadd.f32 1.0, %v2567_v63 }
 0xd53   :  { %v1155_v3 = vadd.f32 1.0, %v2569_v0 }
 0xd54   :  { %2570 = vrcp.f32 %v1090_v2 }
 0xd55   :  { %2572 = vrcp.f32 %v1155_v3 }
 0xd5e   :  { %v2571_v4 = vpop.eup %2570 }
 0xd5f   :  { %v2573_v7 = vpop.eup %2572  ;;  %v1094_v9 = vmul.f32 %v2571_v4, %v3241_v20 }
 0xd60   :  { %v1162_v14 = vmul.f32 %v2573_v7, %v1160_v11 }
 0xdc0   :  { %v1097_v5 = vpop.permute.xlu1 %1096 }
 0xdc1   :  { %v1099_v6 = vmul.f32 %v2571_v4, %v1097_v5 }
 0xdc3   :  { %1101 = vrot.lane.b32.xlu1 %v1099_v6, %s2882_s6  ;;  %v1165_v29 = vpop.permute.xlu0 %1164 }
 0xdc4   :  { %v1167_v8 = vmul.f32 %v2573_v7, %v1165_v29 }
 0xdc6   :  { %1169 = vrot.lane.b32.xlu0 %v1167_v8, %s2882_s6 }
 0xe35   :  { %v1102_v12 = vpop.permute.xlu1 %1101 }
 0xe36   :  { %v3286_v13 = vadd.f32 %v1102_v12, %v1094_v9 }
 0xe38   :  { %2574 = vtanh.f32 %v3286_v13  ;;  %v1170_v16 = vpop.permute.xlu0 %1169 }
 0xe39   :  { %v3289_v17 = vadd.f32 %v1170_v16, %v1162_v14 }
 0xe3b   :  { %2576 = vtanh.f32 %v3289_v17 }
 0xe42   :  { %v2575_v18 = vpop.eup %2574 }
 0xe43   :  { %1107 = vrot.lane.b32.xlu1 %v2575_v18, %s2872_s30 }
 0xe45   :  { %v2577_v19 = vpop.eup %2576 }
 0xe46   :  { %1175 = vrot.lane.b32.xlu0 %v2577_v19, %s2872_s30 }
 0xeb5   :  { %v1108_v20 = vpop.permute.xlu1 %1107 }
 0xeb6   :  { %v1110_v23 = vmul.f32 %v2571_v4, %v1108_v20 }
 0xeb8   :  { %v1180_v22 = vpack.c.bf16 %v1110_v23, %v1110_v23  ;;  %v1902_v25 = vrot.slane %v1110_v23, 2  ;;  %v1176_v26 = vpop.permute.xlu0 %1175 }
 0xeb9   :  { %v1178_v24 = vmul.f32 %v2573_v7, %v1176_v26  ;;  %v1350_v7 = vrot.slane %v3289_v17, 6 }
 0xeba   :  { %1182 = vrot.lane.b32.xlu1 %v1180_v22, %s2882_s6  ;;  %v3297_v21 = vsel %vm1915_vm7, %v3254_v38, %v1902_v25 }
 0xebb   :  { %v1179_v28 = vpack.c.bf16 %v1178_v24, %v1178_v24 }
 0xebd   :  { %1228 = vrot.lane.b32.xlu0 %v1179_v28, %s2882_s6 }
 0xf2c   :  { %v1183_v30 = vpop.permute.xlu1 %1182 }
 0xf2d   :  { %2371 = vmatmul.mubr.msk.bf16.vlgmr.msra.gmra.mrb[28].mxu1 %vm314_vm5, %v1183_v30 }
 0xf2e   :  { %2383 = vmatpush3.bf16.msra.mxu1 %v3064_v10  ;;  %2386 = vmatprep.mubr.msk.bf16.mxu1 %vm2878_vm0, %v2879_v1 }
 0xf2f   :  { %2384 = vmatprep.subr.bf16.mxu1 %v2879_v1  ;;  %v1229_v32 = vpop.permute.xlu0 %1228 }
 0xf30   :  { %2379 = vmatmul.mubr.msk.bf16.vlgmr.msra.gmra.mrb[32].mxu0 %vm314_vm5, %v1229_v32 }
 0xf31   :  { %2391 = vmatpush3.bf16.msra.mxu0 %v3093_v31  ;;  %2394 = vmatprep.mubr.msk.bf16.mxu0 %vm2878_vm0, %v2879_v1 }
 0xf32   :  { %2385 = vmatpush3.bf16.msra.mxu1 %v3068_v15  ;;  %2392 = vmatprep.subr.bf16.mxu0 %v2879_v1 }
 0xf33   :  { %2398 = vmatprep.subr.bf16.mxu1 %v2879_v1 }
 0xf35   :  { %2387 = vmatmul.mubr.msk.bf16.vlgmr.msra.gmra.mrb[32].mxu1 %vm314_vm5, %v1229_v32  ;;  %2393 = vmatpush3.bf16.msra.mxu0 %v3098_v36 }
 0xf36   :  { %2399 = vmatpush3.bf16.msra.mxu1 %v3117_v49  ;;  %2406 = vmatprep.subr.bf16.mxu0 %v2879_v1 }
 0xf37   :  { %2400 = vmatprep.subr.bf16.mxu1 %v2879_v1  ;;  %2402 = vmatprep.mubr.msk.bf16.mxu1 %vm2878_vm0, %v2879_v1 }
 0xf3a   :  { %2401 = vmatpush3.bf16.msra.mxu1 %v3120_v50 }
 0xf3b   :  { %2414 = vmatprep.subr.bf16.mxu1 %v2879_v1 }
0x1000   :  { %v1221_v33 = vpop.f32.mrb[28].mxu1 }
0x1001   :  { %v2372_v35 = vpop.f32.mrb[29].mxu1 }
0x1002   :  { %v1224_v37 = vpop.f32.mrb[30].mxu1 }
0x1003   :  { %v2373_v38 = vpop.f32.mrb[31].mxu1  ;;  %v1267_v39 = vpop.f32.mrb[32].mxu0 }
0x1004   :  { %v1268_v34 = vadd.f32 %v1267_v39, %v1221_v33  ;;  %v2380_v40 = vpop.f32.mrb[33].mxu0 }
0x1005   :  { %v1270_v42 = vpop.f32.mrb[34].mxu0 }
0x1006   :  { %v1273_v41 = vadd.f32 %v3144_v60, %v1268_v34  ;;  %v2381_v43 = vpop.f32.mrb[35].mxu0 }
0x1008   :  { %2578 = vtanh.f32 %v1273_v41  ;;  %v1332_v44 = vpop.f32.mrb[32].mxu1  ;;  %v2144_v54 = vmul.f32 -1.442695, %v1273_v41 }
0x1009   :  { %v1339_v45 = vrot.slane %v1332_v44, 6  ;;  %v2388_v46 = vpop.f32.mrb[33].mxu1 }
0x100a   :  { %v1335_v47 = vpop.f32.mrb[34].mxu1 }
0x100b   :  { %v1341_v48 = vadd.f32 %v1339_v45, %v3089_v27  ;;  %v2389_v51 = vpop.f32.mrb[35].mxu1 }
0x100d   :  { %2580 = vtanh.f32 %v1341_v48  ;;  %v2146_v55 = vmul.f32 -1.442695, %v1341_v48 }
0x100e   :  { %2582 = vpow2.f32 %v2144_v54 }
0x100f   :  { %2584 = vpow2.f32 %v2146_v55 }
0x1012   :  { %v2579_v52 = vpop.eup %2578 }
0x1013   :  { %1283 = vrot.lane.b32.xlu1 %v2579_v52, %s2872_s30 }
0x1017   :  { %v2581_v53 = vpop.eup %2580 }
0x1018   :  { %1354 = vrot.lane.b32.xlu0 %v2581_v53, %s2872_s30  ;;  %v2583_v56 = vpop.eup %2582 }
0x1019   :  { %v1277_v57 = vadd.f32 1.0, %v2583_v56  ;;  %v2585_v58 = vpop.eup %2584 }
0x101a   :  { %v1345_v59 = vadd.f32 1.0, %v2585_v58 }
0x101b   :  { %2586 = vrcp.f32 %v1277_v57 }
0x101c   :  { %2588 = vrcp.f32 %v1345_v59 }
0x1025   :  { %v2587_v61 = vpop.eup %2586 }
0x1026   :  { %v2589_v0 = vpop.eup %2588  ;;  %v1281_v4 = vmul.f32 %v2587_v61, %v3286_v13 }
0x1027   :  { %v1352_v29 = vmul.f32 %v2589_v0, %v1350_v7 }
0x1085   :  { %v1284_v62 = vpop.permute.xlu1 %1283 }
0x1086   :  { %v1286_v63 = vmul.f32 %v2587_v61, %v1284_v62 }
0x1088   :  { %1288 = vrot.lane.b32.xlu1 %v1286_v63, %s2882_s6 }
0x108a   :  { %v1355_v2 = vpop.permute.xlu0 %1354 }
0x108b   :  { %v1357_v3 = vmul.f32 %v2589_v0, %v1355_v2 }
0x108d   :  { %1359 = vrot.lane.b32.xlu0 %v1357_v3, %s2882_s6 }
0x10fa   :  { %v1289_v5 = vpop.permute.xlu1 %1288 }
0x10fb   :  { %v3328_v6 = vadd.f32 %v1289_v5, %v1281_v4 }
0x10fd   :  { %2590 = vtanh.f32 %v3328_v6 }
0x10ff   :  { %v1360_v8 = vpop.permute.xlu0 %1359 }
0x1100   :  { %v3332_v9 = vadd.f32 %v1360_v8, %v1352_v29  ;;  %v2650_v8 = vld [vmem:[#allocation8] sm:$0xff]  }
0x1102   :  { %2592 = vtanh.f32 %v3332_v9  ;;  %v1541_v54 = vrot.slane %v3332_v9, 6 }
0x1107   :  { %v2591_v11 = vpop.eup %2590 }
0x1108   :  { %1294 = vrot.lane.b32.xlu1 %v2591_v11, %s2872_s30  ;;  %v2651_v11 = vld [vmem:[#allocation11] sm:$0xff]  }
0x110c   :  { %v2593_v12 = vpop.eup %2592 }
0x110d   :  { %1365 = vrot.lane.b32.xlu0 %v2593_v12, %s2872_s30  ;;  %v2652_v12 = vld [vmem:[#allocation8 + $0x8] sm:$0xff]  }
0x117a   :  { %v1295_v13 = vpop.permute.xlu1 %1294 }
0x117b   :  { %v3337_v14 = vmul.f32 %v2587_v61, %v1295_v13  ;;  %v2653_v13 = vld [vmem:[#allocation11 + $0x8] sm:$0xff]  }
0x117d   :  { %v1370_v16 = vpack.c.bf16 %v3337_v14, %v3337_v14 }
0x117f   :  { %v1366_v17 = vpop.permute.xlu0 %1365  ;;  %1372 = vrot.lane.b32.xlu1 %v1370_v16, %s2882_s6  ;;  %v2654_v16 = vld [vmem:[#allocation10] sm:$0xff]  }
0x1180   :  { %v1368_v18 = vmul.f32 %v2589_v0, %v1366_v17  ;;  %v2655_v17 = vld [vmem:[#allocation10 + $0x8] sm:$0xff]  }
0x1182   :  { %v1369_v19 = vpack.c.bf16 %v1368_v18, %v1368_v18 }
0x1184   :  { %v1418_v20 = vrot.slane %v1369_v19, 1 }
0x1186   :  { %1419 = vrot.lane.b32.xlu0 %v1418_v20, %s2882_s6 }
0x11f1   :  { %v1373_v23 = vpop.permute.xlu1 %1372 }
0x11f2   :  { %2395 = vmatmul.mubr.msk.bf16.vlgmr.msra.gmra.mrb[36].mxu0 %vm314_vm5, %v1373_v23 }
0x11f3   :  { %2407 = vmatpush3.bf16.msra.mxu0 %v3064_v10  ;;  %2410 = vmatprep.mubr.msk.bf16.mxu0 %vm2878_vm0, %v2879_v1 }
0x11f4   :  { %2408 = vmatprep.subr.bf16.mxu0 %v2879_v1 }
0x11f7   :  { %2409 = vmatpush3.bf16.msra.mxu0 %v3068_v15 }
0x11f8   :  { %v1420_v22 = vpop.permute.xlu0 %1419  ;;  %2422 = vmatprep.subr.bf16.mxu0 %v2879_v1 }
0x11f9   :  { %2403 = vmatmul.mubr.msk.bf16.vlgmr.msra.gmra.mrb[36].mxu1 %vm314_vm5, %v1420_v22 }
0x11fa   :  { %2411 = vmatmul.mubr.msk.bf16.vlgmr.msra.gmra.mrb[40].mxu0 %vm314_vm5, %v1420_v22  ;;  %2415 = vmatpush3.bf16.msra.mxu1 %v3093_v31 }
0x11fb   :  { %2416 = vmatprep.subr.bf16.mxu1 %v2879_v1  ;;  %2423 = vmatpush3.bf16.msra.mxu0 %v3117_v49 }
0x11fc   :  { %2418 = vmatprep.mubr.msk.bf16.mxu1 %vm2878_vm0, %v2879_v1  ;;  %2424 = vmatprep.subr.bf16.mxu0 %v2879_v1 }
0x11fd   :  { %2426 = vmatprep.mubr.msk.bf16.mxu0 %vm2878_vm0, %v2879_v1 }
0x11fe   :  { %2417 = vmatpush3.bf16.msra.mxu1 %v3098_v36 }
0x11ff   :  { %2430 = vmatprep.subr.bf16.mxu1 %v2879_v1  ;;  %2425 = vmatpush3.bf16.msra.mxu0 %v3120_v50 }
0x1200   :  { %2438 = vmatprep.subr.bf16.mxu0 %v2879_v1 }
0x12c5   :  { %v1411_v10 = vpop.f32.mrb[36].mxu0 }
0x12c6   :  { %v2396_v15 = vpop.f32.mrb[37].mxu0 }
0x12c7   :  { %v1414_v31 = vpop.f32.mrb[38].mxu0 }
0x12c8   :  { %v2397_v49 = vpop.f32.mrb[39].mxu0 }
0x12cc   :  { %v1458_v25 = vpop.f32.mrb[36].mxu1 }
0x12cd   :  { %v1459_v26 = vadd.f32 %v1458_v25, %v1411_v10  ;;  %v2404_v24 = vpop.f32.mrb[37].mxu1  ;;  %v1523_v28 = vpop.f32.mrb[40].mxu0 }
0x12ce   :  { %v1461_v30 = vpop.f32.mrb[38].mxu1  ;;  %v1530_v32 = vrot.slane %v1523_v28, 4  ;;  %v2412_v33 = vpop.f32.mrb[41].mxu0 }
0x12cf   :  { %v1464_v35 = vadd.f32 %v3144_v60, %v1459_v26  ;;  %v2405_v36 = vpop.f32.mrb[39].mxu1  ;;  %v1526_v37 = vpop.f32.mrb[42].mxu0 }
0x12d0   :  { %v1532_v38 = vadd.f32 %v1530_v32, %v3089_v27  ;;  %v2413_v50 = vpop.f32.mrb[43].mxu0 }
0x12d1   :  { %2594 = vtanh.f32 %v1464_v35  ;;  %v2149_v40 = vmul.f32 -1.442695, %v1464_v35 }
0x12d2   :  { %2596 = vtanh.f32 %v1532_v38  ;;  %v2151_v42 = vmul.f32 -1.442695, %v1532_v38 }
0x12d3   :  { %2598 = vpow2.f32 %v2149_v40 }
0x12d4   :  { %2600 = vpow2.f32 %v2151_v42 }
0x12db   :  { %v2595_v39 = vpop.eup %2594 }
0x12dc   :  { %v2597_v34 = vpop.eup %2596  ;;  %1474 = vrot.lane.b32.xlu1 %v2595_v39, %s2872_s30 }
0x12dd   :  { %1545 = vrot.lane.b32.xlu0 %v2597_v34, %s2872_s30  ;;  %v2599_v41 = vpop.eup %2598 }
0x12de   :  { %v2601_v43 = vpop.eup %2600  ;;  %v1468_v44 = vadd.f32 1.0, %v2599_v41 }
0x12df   :  { %v1536_v45 = vadd.f32 1.0, %v2601_v43 }
0x12e0   :  { %2602 = vrcp.f32 %v1468_v44 }
0x12e1   :  { %2604 = vrcp.f32 %v1536_v45 }
0x12ea   :  { %v2603_v46 = vpop.eup %2602 }
0x12eb   :  { %v2605_v48 = vpop.eup %2604  ;;  %v1472_v55 = vmul.f32 %v2603_v46, %v3328_v6 }
0x12ec   :  { %v1543_v57 = vmul.f32 %v2605_v48, %v1541_v54 }
0x134e   :  { %v1475_v47 = vpop.permute.xlu1 %1474 }
0x134f   :  { %v1477_v51 = vmul.f32 %v2603_v46, %v1475_v47  ;;  %v1546_v52 = vpop.permute.xlu0 %1545 }
0x1350   :  { %v1548_v53 = vmul.f32 %v2605_v48, %v1546_v52 }
0x1351   :  { %1479 = vrot.lane.b32.xlu1 %v1477_v51, %s2882_s6 }
0x1352   :  { %1550 = vrot.lane.b32.xlu0 %v1548_v53, %s2882_s6 }
0x13c3   :  { %v1480_v56 = vpop.permute.xlu1 %1479 }
0x13c4   :  { %v3372_v58 = vadd.f32 %v1480_v56, %v1472_v55  ;;  %v1551_v59 = vpop.permute.xlu0 %1550 }
0x13c5   :  { %v3374_v61 = vadd.f32 %v1551_v59, %v1543_v57 }
0x13c6   :  { %2606 = vtanh.f32 %v3372_v58 }
0x13c7   :  { %2608 = vtanh.f32 %v3374_v61  ;;  %v1732_v47 = vrot.slane %v3374_v61, 6 }
0x13d0   :  { %v2607_v62 = vpop.eup %2606 }
0x13d1   :  { %v2609_v63 = vpop.eup %2608  ;;  %1485 = vrot.lane.b32.xlu1 %v2607_v62, %s2872_s30 }
0x13d2   :  { %1556 = vrot.lane.b32.xlu0 %v2609_v63, %s2872_s30 }
0x1443   :  { %v1486_v0 = vpop.permute.xlu1 %1485 }
0x1444   :  { %v3380_v2 = vmul.f32 %v2603_v46, %v1486_v0  ;;  %v1557_v3 = vpop.permute.xlu0 %1556 }
0x1445   :  { %v1559_v4 = vmul.f32 %v2605_v48, %v1557_v3 }
0x1446   :  { %v1561_v5 = vpack.c.bf16 %v3380_v2, %v3380_v2  ;;  %v1905_v55 = vrot.slane %v3380_v2, 6 }
0x1447   :  { %v1560_v6 = vpack.c.bf16 %v1559_v4, %v1559_v4 }
0x1448   :  { %1563 = vrot.lane.b32.xlu1 %v1561_v5, %s2882_s6  ;;  %v1917_v61 = vsel %vm253_vm2, %v3337_v14, %v1905_v55 }
0x1449   :  { %v1609_v7 = vrot.slane %v1560_v6, 2 }
0x144b   :  { %1610 = vrot.lane.b32.xlu0 %v1609_v7, %s2882_s6 }
0x14ba   :  { %v1564_v29 = vpop.permute.xlu1 %1563 }
0x14bb   :  { %2419 = vmatmul.mubr.msk.bf16.vlgmr.msra.gmra.mrb[40].mxu1 %vm314_vm5, %v1564_v29 }
0x14bc   :  { %2431 = vmatpush3.bf16.msra.mxu1 %v2650_v8  ;;  %2434 = vmatprep.mubr.msk.bf16.mxu1 %vm2878_vm0, %v2879_v1 }
0x14bd   :  { %2432 = vmatprep.subr.bf16.mxu1 %v2879_v1  ;;  %v1611_v9 = vpop.permute.xlu0 %1610 }
0x14be   :  { %2427 = vmatmul.mubr.msk.bf16.vlgmr.msra.gmra.mrb[44].mxu0 %vm314_vm5, %v1611_v9 }
0x14bf   :  { %2439 = vmatpush3.bf16.msra.mxu0 %v2651_v11  ;;  %2442 = vmatprep.mubr.msk.bf16.mxu0 %vm2878_vm0, %v2879_v1 }
0x14c0   :  { %2433 = vmatpush3.bf16.msra.mxu1 %v2652_v12  ;;  %2440 = vmatprep.subr.bf16.mxu0 %v2879_v1 }
0x14c1   :  { %2446 = vmatprep.subr.bf16.mxu1 %v2879_v1 }
0x14c3   :  { %2435 = vmatmul.mubr.msk.bf16.vlgmr.msra.gmra.mrb[44].mxu1 %vm314_vm5, %v1611_v9  ;;  %2441 = vmatpush3.bf16.msra.mxu0 %v2653_v13  ;;  %v2656_v13 = vld [vmem:[%s3542_s9] ss:$0 sm:$0xff] }
0x14c4   :  { %2447 = vmatpush3.bf16.msra.mxu1 %v2654_v16  ;;  %2450 = vmatprep.mubr.msk.bf16.mxu1 %vm2878_vm0, %v2879_v1 }
0x14c5   :  { %2448 = vmatprep.subr.bf16.mxu1 %v2879_v1 }
0x14c8   :  { %2449 = vmatpush3.bf16.msra.mxu1 %v2655_v17 }
0x158e   :  { %v1602_v18 = vpop.f32.mrb[40].mxu1 }
0x158f   :  { %v2420_v19 = vpop.f32.mrb[41].mxu1 }
0x1590   :  { %v1605_v20 = vpop.f32.mrb[42].mxu1 }
0x1591   :  { %v2421_v23 = vpop.f32.mrb[43].mxu1  ;;  %v1649_v22 = vpop.f32.mrb[44].mxu0 }
0x1592   :  { %v1650_v10 = vadd.f32 %v1649_v22, %v1602_v18  ;;  %v2428_v15 = vpop.f32.mrb[45].mxu0 }
0x1593   :  { %v1652_v31 = vpop.f32.mrb[46].mxu0 }
0x1594   :  { %v1655_v49 = vadd.f32 %v3144_v60, %v1650_v10  ;;  %v2429_v25 = vpop.f32.mrb[47].mxu0 }
0x1596   :  { %2610 = vtanh.f32 %v1655_v49  ;;  %v1714_v26 = vpop.f32.mrb[44].mxu1  ;;  %v2154_v36 = vmul.f32 -1.442695, %v1655_v49 }
0x1597   :  { %v1721_v24 = vrot.slane %v1714_v26, 2  ;;  %v2436_v28 = vpop.f32.mrb[45].mxu1 }
0x1598   :  { %v1717_v30 = vpop.f32.mrb[46].mxu1  ;;  %v1921_v28 = vld [vmem:[%s3543_s10 + $0x8] sm:$0xff] }
0x1599   :  { %v1723_v1 = vadd.f32 %v1721_v24, %v3089_v27  ;;  %v2437_v32 = vpop.f32.mrb[47].mxu1  ;;  %v1920_v24 = vld [vmem:[%s3543_s10] sm:$0xff]  ;;  %v1922_v30 = vld [vmem:[%s3543_s10 + $0x10] sm:$0xff] }
0x159b   :  { %2612 = vtanh.f32 %v1723_v1  ;;  %v2156_v37 = vmul.f32 -1.442695, %v1723_v1  ;;  %v1923_v1 = vld [vmem:[%s3543_s10 + $0x18] sm:$0xff] }
0x159c   :  { %2614 = vpow2.f32 %v2154_v36  ;;  %v2472_v32 = vpack.c.bf16 %v1923_v1, %v1922_v30 }
0x159d   :  { %2616 = vpow2.f32 %v2156_v37 }
0x15a0   :  { %v2611_v33 = vpop.eup %2610 }
0x15a1   :  { %1665 = vrot.lane.b32.xlu0 %v2611_v33, %s2872_s30 }
0x15a5   :  { %v2613_v35 = vpop.eup %2612 }
0x15a6   :  { %1736 = vrot.lane.b32.xlu1 %v2613_v35, %s2872_s30  ;;  %v2615_v60 = vpop.eup %2614 }
0x15a7   :  { %v1659_v38 = vadd.f32 1.0, %v2615_v60  ;;  %v2617_v50 = vpop.eup %2616 }
0x15a8   :  { %v1727_v39 = vadd.f32 1.0, %v2617_v50  ;;  %v2160_v50 = vld [vmem:[%s3544_s11] ss:$0 sm:$0xff]  ;;  %s2883_s11 = smov [#allocation14]  }
0x15a9   :  { %2618 = vrcp.f32 %v1659_v38 }
0x15aa   :  { %2620 = vrcp.f32 %v1727_v39 }
0x15b3   :  { %v2619_v34 = vpop.eup %2618 }
0x15b4   :  { %v2621_v42 = vpop.eup %2620  ;;  %v1663_v44 = vmul.f32 %v2619_v34, %v3372_v58 }
0x15b5   :  { %v1734_v48 = vmul.f32 %v2621_v42, %v1732_v47 }
0x1613   :  { %v1666_v27 = vpop.permute.xlu0 %1665 }
0x1614   :  { %v1668_v40 = vmul.f32 %v2619_v34, %v1666_v27 }
0x1616   :  { %1670 = vrot.lane.b32.xlu0 %v1668_v40, %s2882_s6 }
0x1618   :  { %v1737_v41 = vpop.permute.xlu1 %1736 }
0x1619   :  { %v1739_v43 = vmul.f32 %v2621_v42, %v1737_v41 }
0x161b   :  { %1741 = vrot.lane.b32.xlu1 %v1739_v43, %s2882_s6 }
0x1688   :  { %v1671_v45 = vpop.permute.xlu0 %1670 }
0x1689   :  { %v1673_v46 = vadd.f32 %v1671_v45, %v1663_v44 }
0x168b   :  { %2622 = vtanh.f32 %v1673_v46 }
0x168d   :  { %v1742_v51 = vpop.permute.xlu1 %1741 }
0x168e   :  { %v3407_v52 = vadd.f32 %v1742_v51, %v1734_v48 }
0x1690   :  { %2624 = vtanh.f32 %v3407_v52 }
0x1695   :  { %v2623_v53 = vpop.eup %2622 }
0x1696   :  { %1676 = vrot.lane.b32.xlu0 %v2623_v53, %s2872_s30 }
0x169a   :  { %v2625_v54 = vpop.eup %2624 }
0x169b   :  { %1747 = vrot.lane.b32.xlu1 %v2625_v54, %s2872_s30 }
0x1708   :  { %v1677_v56 = vpop.permute.xlu0 %1676 }
0x1709   :  { %v1679_v57 = vmul.f32 %v2619_v34, %v1677_v56 }
0x170b   :  { %v1752_v58 = vpack.c.bf16 %v1679_v57, %v1679_v57  ;;  %v1908_v59 = vrot.slane %v1679_v57, 4 }
0x170d   :  { %v1748_v62 = vpop.permute.xlu1 %1747  ;;  %1754 = vrot.lane.b32.xlu1 %v1752_v58, %s2882_s6  ;;  %v1918_v63 = vsel %vm1913_vm6, %v1917_v61, %v1908_v59 }
0x170e   :  { %v3417_v0 = vmul.f32 %v2621_v42, %v1748_v62 }
0x1710   :  { %v1751_v3 = vpack.c.bf16 %v3417_v0, %v3417_v0 }
0x1712   :  { %v1800_v4 = vrot.slane %v1751_v3, 3 }
0x1714   :  { %1801 = vrot.lane.b32.xlu0 %v1800_v4, %s2882_s6 }
0x177f   :  { %v1755_v2 = vpop.permute.xlu1 %1754 }
0x1780   :  { %2443 = vmatmul.mubr.msk.bf16.vlgmr.msra.gmra.mrb[48].mxu0 %vm314_vm5, %v1755_v2 }
0x1786   :  { %v1802_v5 = vpop.permute.xlu0 %1801 }
0x1787   :  { %2451 = vmatmul.mubr.msk.bf16.vlgmr.msra.gmra.mrb[48].mxu1 %vm314_vm5, %v1802_v5 }
0x1853   :  { %v1793_v14 = vpop.f32.mrb[48].mxu0 }
0x1854   :  { %v2444_v6 = vpop.f32.mrb[49].mxu0 }
0x1855   :  { %v1796_v7 = vpop.f32.mrb[50].mxu0 }
0x1856   :  { %v2445_v29 = vpop.f32.mrb[51].mxu0 }
0x185a   :  { %v1840_v8 = vpop.f32.mrb[48].mxu1 }
0x185b   :  { %v1841_v9 = vadd.f32 %v1840_v8, %v1793_v14  ;;  %v2452_v11 = vpop.f32.mrb[49].mxu1 }
0x185c   :  { %v1843_v12 = vpop.f32.mrb[50].mxu1 }
0x185d   :  { %v1846_v16 = vadd.f32 %v2656_v13, %v1841_v9  ;;  %v2453_v17 = vpop.f32.mrb[51].mxu1 }
0x185f   :  { %2626 = vtanh.f32 %v1846_v16  ;;  %v2159_v19 = vmul.f32 -1.442695, %v1846_v16 }
0x1861   :  { %2628 = vpow2.f32 %v2159_v19 }
0x1869   :  { %v2627_v18 = vpop.eup %2626 }
0x186a   :  { %1856 = vrot.lane.b32.xlu1 %v2627_v18, %s2872_s30 }
0x186b   :  { %v2629_v20 = vpop.eup %2628 }
0x186c   :  { %v1850_v23 = vadd.f32 1.0, %v2629_v20 }
0x186e   :  { %2630 = vrcp.f32 %v1850_v23 }
0x1878   :  { %v2631_v22 = vpop.eup %2630 }
0x1879   :  { %v1854_v31 = vmul.f32 %v2631_v22, %v1673_v46 }
0x18dc   :  { %v1857_v10 = vpop.permute.xlu1 %1856 }
0x18dd   :  { %v1859_v15 = vmul.f32 %v2631_v22, %v1857_v10 }
0x18df   :  { %1861 = vrot.lane.b32.xlu0 %v1859_v15, %s2882_s6 }
0x18e3   :  { %1933 = vrot.lane.b32.xlu0 %v3297_v21, %s2882_s6  ;;  %v2468_v21 = vpack.c.bf16 %v1921_v28, %v1920_v24 }
0x18e5   :  { %2469 = vmatprep.subr.bf16.mxu0 %v2468_v21 }
0x18e6   :  { %2471 = vmatpush3.bf16.msra.mxu0 %v2468_v21 }
0x18e7   :  { %2473 = vmatprep.subr.bf16.mxu0 %v2472_v32 }
0x18ea   :  { %2475 = vmatpush3.bf16.msra.mxu0 %v2472_v32 }
0x1951   :  { %v1862_v49 = vpop.permute.xlu0 %1861 }
0x1952   :  { %v1864_v25 = vadd.f32 %v1862_v49, %v1854_v31 }
0x1954   :  { %2632 = vtanh.f32 %v1864_v25 }
0x1955   :  { %v1934_v26 = vpop.permute.xlu0 %1933 }
0x1956   :  { %2462 = vmatprep.mubr.msk.f32.mxu0 %vm314_vm5, %v1934_v26 }
0x195e   :  { %v2633_v33 = vpop.eup %2632 }
0x195f   :  { %1867 = vrot.lane.b32.xlu1 %v2633_v33, %s2872_s30  ;;  %s2073_s30 = sshll.u32 %s2883_s11, 4  ;;  %s2074_s30 = int_to_ptr.vmem [resolvable:$true] %s2073_s30 }
0x1960   :  { %s2789_s8 = scalar_lea.vmem %s2074_s30, 64  ;;  %p2794_p7 = scmp.lt.s32.totalorder %s2074_s30, %s2074_s30 }
0x1961   :  { %p2790_p6 = scmp.ne.s32.totalorder %s2074_s30, %s2789_s8  ;;  %p2795_p8 = scmp.lt.s32.totalorder %s2789_s8, %s2789_s8 }
0x1963   :  { %p2796_p9 = por %p2795_p8, %p2794_p7 }
0x1965   :  { %p2797_p10 = pnand %p2796_p9, %p2790_p6 }
0x19d1   :  { %v1868_v35 = vpop.permute.xlu1 %1867 }
0x19d2   :  { %v1870_v36 = vmul.f32 %v2631_v22, %v1868_v35 }
0x19d4   :  { %v1910_v37 = vrot.slane %v1870_v36, 2 }
0x19d6   :  { %v1919_v60 = vsel %vm1915_vm7, %v1918_v63, %v1910_v37 }
0x19d7   :  { %1935 = vrot.lane.b32.xlu1 %v1919_v60, %s2882_s6 }
0x1a49   :  { %v1936_v38 = vpop.permute.xlu1 %1935 }
0x1a4a   :  { %2463 = vmatmul.mubr.msk.f32.vlgmr.msra.gmra.mrb[2].mxu0 %vm314_vm5, %v1936_v38 }
0x1b1d   :  { %v2464_v39 = vpop.f32.mrb[2].mxu0 }
0x1b1e   :  { %v3451_v34 = vadd.f32 %v2464_v39, %v2160_v50  ;;  %v2007_v27 = vpop.f32.mrb[3].mxu0 }
0x1b1f   :  { %v3453_v40 = vadd.f32 %v2160_v50, %v2007_v27 }
0x1b20   :  { %v2020_v42 = vsel %vm2016_vm8, %v3451_v34, -inf  ;;  %v2041_v58 = vmul.f32 1.442695, %v3451_v34 }
0x1b21   :  { %2021 = vmax.xlane.f32.xlu1 %v2020_v42  ;;  %v2017_v41 = vsel %vm2016_vm8, %v3453_v40, -inf  ;;  %v2039_v61 = vmul.f32 1.442695, %v3453_v40 }
0x1b22   :  { %2018 = vmax.xlane.f32.xlu0 %v2017_v41 }
0x1b32   :  { %1872 = vrot.lane.b32.xlu1 %v3417_v0, %s2882_s6 }
0x1b36   :  { %1885 = vrot.lane.b32.xlu1 %v3407_v52, %s2881_s3 }
0x1b3a   :  { %1890 = vrot.lane.b32.xlu1 %v1864_v25, %s2881_s3 }
0x1bae   :  { %v2022_v43 = vpop.xlane.xlu1 %2021 }
0x1baf   :  { %v2024_v44 = vsub.f32 %v3451_v34, %v2022_v43  ;;  %v2019_v45 = vpop.xlane.xlu0 %2018 }
0x1bb0   :  { %v2023_v46 = vsub.f32 %v3453_v40, %v2019_v45 }
0x1bb1   :  { %v2027_v47 = vmul.f32 1.442695, %v2024_v44 }
0x1bb2   :  { %v2025_v48 = vmul.f32 1.442695, %v2023_v46  ;;  %v1873_v51 = vpop.permute.xlu1 %1872 }
0x1bb3   :  { %2634 = vpow2.f32 %v2027_v47  ;;  %1876 = vst.msk [vmem:[#allocation14 - $0x6] sm:$0xc0] %vm1875_vm9, %v1873_v51 }
0x1bb4   :  { %2636 = vpow2.f32 %v2025_v48 }
0x1bb6   :  { %v1886_v53 = vpop.permute.xlu1 %1885 }
0x1bb7   :  { %1888 = vst.msk [vmem:[#allocation16 - $0x6] sm:$0xc0] %vm1875_vm9, %v1886_v53 }
0x1bba   :  { %v1891_v54 = vpop.permute.xlu1 %1890 }
0x1bbb   :  { %1894 = vst.msk [vmem:[#allocation16 + $0x2] sm:$0x3] %vm1882_vm10, %v1891_v54 }
0x1bbd   :  { %v2635_v52 = vpop.eup %2634 }
0x1bbe   :  { %v2032_v55 = vsel %vm2016_vm8, %v2635_v52, 0.0  ;;  %v2637_v56 = vpop.eup %2636 }
0x1bbf   :  { %2033 = vadd.xlane.f32.xlu0 %v2032_v55  ;;  %v2029_v57 = vsel %vm2016_vm8, %v2637_v56, 0.0 }
0x1bc3   :  { %2030 = vadd.xlane.f32.xlu0 %v2029_v57 }
0x1bd9   :  { %1878 = vrot.lane.b32.xlu0 %v1870_v36, %s2882_s6 }
0x1c4c   :  { %v2034_v59 = vpop.xlane.xlu0 %2033 }
0x1c4d   :  { %2638 = vrcp.f32 %v2034_v59 }
0x1c4e   :  { %2640 = vtanh.f32 %v3451_v34 }
0x1c4f   :  { %2642 = vpow2.f32 %v2041_v58 }
0x1c50   :  { %v2031_v62 = vpop.xlane.xlu0 %2030 }
0x1c51   :  { %2644 = vrcp.f32 %v2031_v62 }
0x1c52   :  { %2646 = vpow2.f32 %v2039_v61 }
0x1c53   :  { %2648 = vtanh.f32 %v3453_v40 }
0x1c54   :  { %v1879_v63 = vpop.permute.xlu0 %1878 }
0x1c55   :  { %1883 = vst.msk [vmem:[#allocation14 + $0x2] sm:$0x3] %vm1882_vm10, %v1879_v63 }
0x1c56   :  { %2800 = shalt.err (!%p2797_p10)
}
0x1c57   :  { %s2801_s18 = scalar_lea.hbm %s3546_s13, 64 }
0x1c58   :  { %p2802_p11 = scmp.ne.s32.totalorder %s3546_s13, %s2801_s18  ;;  %p2805_p12 = scmp.lt.u32.totalorder %s2801_s18, %s3546_s13 }
0x1c5a   :  { %p2807_p13 = pnand %p2805_p12, %p2802_p11 }
0x1c5c   :  { %2810 = shalt.err (!%p2807_p13)
}
0x1c5d   :  { %s2885_s26 = smov 2   ;;  %v2639_v0 = vpop.eup %2638  ;;  %s2811_s9 = scalar_lea.vmem %s3473_s29, 64 }
0x1c5e   :  { %2079 = dma.vmem_to_hbm [thread:$0]  %s2074_s30, 64, %s3546_s13, [#allocation15], %s2882_s6, %s2882_s6, %s2885_s26  }
0x1c5f   :  { %p2812_p0 = scmp.ne.s32.totalorder %s3473_s29, %s2811_s9  ;;  %p2816_p1 = scmp.lt.s32.totalorder %s3473_s29, %s3473_s29 }
0x1c60   :  { %p2817_p2 = scmp.lt.s32.totalorder %s2811_s9, %s2811_s9 }
0x1c62   :  { %p2818_p3 = por %p2817_p2, %p2816_p1 }
0x1c64   :  { %p2819_p4 = pnand %p2818_p3, %p2812_p0 }
0x1c66   :  { %2822 = shalt.err (!%p2819_p4)
}
0x1c67   :  { %s2823_s5 = scalar_lea.hbm %s3547_s14, 64 }
0x1c68   :  { %p2824_p5 = scmp.ne.s32.totalorder %s3547_s14, %s2823_s5  ;;  %p2827_p6 = scmp.lt.u32.totalorder %s2823_s5, %s3547_s14 }
0x1c6a   :  { %p2829_p7 = pnand %p2827_p6, %p2824_p5 }
0x1c6c   :  { %2832 = shalt.err (!%p2829_p7)
}
0x1c6d   :  { %2091 = dma.vmem_to_hbm [thread:$0]  %s3473_s29, 64, %s3547_s14, [#allocation15], %s2882_s6, %s2882_s6, %s2885_s26   ;;  %v2038_v3 = vmul.f32 %v2639_v0, %v2635_v52  ;;  %vm2047_vm11 = vcmask 195584   ;;  %v2641_v4 = vpop.eup %2640  ;;  %vm2050_vm12 = vcmask 326656   ;;  %vm2053_vm13 = vcmask 392192  }
0x1c6e   :  { %v2643_v2 = vpop.eup %2642  ;;  %s2886_s10 = smov [#allocation13]  }
0x1c6f   :  { %v2046_v5 = vsel %vm2016_vm8, %v2038_v3, %v3451_v34  ;;  %v2645_v14 = vpop.eup %2644  ;;  %s2061_s11 = sshll.u32 %s2886_s10, 4  ;;  %s2062_s11 = int_to_ptr.vmem [resolvable:$true] %s2061_s11 }
0x1c70   :  { %v2049_v6 = vsel %vm2047_vm11, %v2046_v5, %v2643_v2  ;;  %v2037_v7 = vmul.f32 %v2645_v14, %v2637_v56  ;;  %v2647_v8 = vpop.eup %2646  ;;  %s2833_s14 = scalar_lea.vmem %s2062_s11, 256  ;;  %p2838_p9 = scmp.lt.s32.totalorder %s2062_s11, %s2062_s11 }
0x1c71   :  { %v2052_v29 = vsel %vm2050_vm12, %v2049_v6, %v2641_v4  ;;  %v2649_v11 = vpop.eup %2648  ;;  %p2834_p8 = scmp.ne.s32.totalorder %s2062_s11, %s2833_s14  ;;  %p2839_p10 = scmp.lt.s32.totalorder %s2833_s14, %s2833_s14 }
0x1c72   :  { %2055 = vst.msk [vmem:[#allocation13 + $0x8] sm:$0xff] %vm2053_vm13, %v2052_v29  ;;  %v2045_v9 = vsel %vm2016_vm8, %v2037_v7, %v3453_v40 }
0x1c73   :  { %v2048_v12 = vsel %vm2047_vm11, %v2045_v9, %v2647_v8  ;;  %p2840_p11 = por %p2839_p10, %p2838_p9 }
0x1c74   :  { %v2051_v13 = vsel %vm2050_vm12, %v2048_v12, %v2649_v11 }
0x1c75   :  { %2054 = vst.msk [vmem:[#allocation13] sm:$0xff] %vm2053_vm13, %v2051_v13  ;;  %p2841_p12 = pnand %p2840_p11, %p2834_p8 }
0x1c77   :  { %2844 = shalt.err (!%p2841_p12)
}
0x1c78   :  { %s2845_s7 = scalar_lea.hbm %s3545_s12, 256 }
0x1c79   :  { %p2846_p13 = scmp.ne.s32.totalorder %s3545_s12, %s2845_s7  ;;  %p2849_p0 = scmp.lt.u32.totalorder %s2845_s7, %s3545_s12 }
0x1c7b   :  { %p2851_p1 = pnand %p2849_p0, %p2846_p13 }
0x1c7d   :  { %2854 = shalt.err (!%p2851_p1)
}
0x1c7e   :  { %2067 = dma.vmem_to_hbm [thread:$0]  %s2062_s11, 256, %s3545_s12, [#allocation4], %s2868_s23, %s2868_s23, %s2869_s24  }
0x1c7f   :  { %2863 = dma.done.wait [#allocation4], 256  }
0x1c80   :  { %2864 = vsyncadd [#allocation4], 4294967040 }
0x1c81   :  { %2865 = dma.done.wait [#allocation15], 128  }
0x1c82   :  { %2866 = vsyncadd [#allocation15], 4294967168 }
0x1c83   :  { %2101 = vsyncpa [#allocation3], 1 }
0x1c84   :  { %2102 = vsyncpa [#allocation6], 1 }
0x1c85   :  { %2103 = vsyncpa [#allocation9], 1 }
0x1c86   :  { %2104 = vsyncpa [#allocation12], 1 }
0x1c87   :  { %2105 = vsyncpa [#allocation4], 1 }
0x1c88   :  { %2106 = vsyncpa [#allocation15], 1 }

</bundles_post_ra>
